<compile_context>
chip_gen: v7x
topology: tpu7x:2x2x1
jax: 0.10.0
libtpu: 0.0.40
codegen_flags: <defaults>
</compile_context>

<pallas_src>
import math

import numpy as np
import jax
import jax.numpy as jnp
from jax.experimental import pallas as pl
from jax.experimental.pallas import tpu as pltpu

# ---------------- small synthetic SigLIP-style config ----------------
B = 2                      # batch
C = 3                      # image channels
IMG = 16                   # spatial size
PATCH = 4                  # patch size
GH = GW = IMG // PATCH     # 4x4 patch grid
S = GH * GW                # 16 native tokens (stand-in for 729)
D = 128                    # hidden size (lane-dense stand-in for 1152)
H = 4                      # attention heads
DH = D // H                # head dim
DM = 256                   # mlp intermediate dim (stand-in for 4304)
LAYERS = 2                 # encoder layers
NUM_TOKENS = 4             # resized token count (stand-in for 64)
TH = TW = int(NUM_TOKENS ** 0.5)
K = C * PATCH * PATCH      # im2col row width (48)
KP = ((K + 127) // 128) * 128   # lane-dense padded im2col width (128)
EPS_LN = 1e-6              # SigLIP layernorm eps

# Images folded into the matmul M dimension per grid step.
# 1  -> grid (B, LAYERS), images shard across v7x's two TensorCores.
# B  -> single batch block, best on single-TC v5e/v6e (bigger MXU row fill).
BATCH_BLOCK = 1

LAYER_KEYS = ("ln1g", "ln1b", "wqkv", "bqkv", "wo", "bo",
              "ln2g", "ln2b", "w1", "b1", "w2", "b2")


# ------------------------------ kernel -------------------------------
def siglip_fused_kernel(patches_ref, pw_ref, pb_ref, pos_ref,
                        ln1g_ref, ln1b_ref, wqkv_ref, bqkv_ref,
                        wo_ref, bo_ref, ln2g_ref, ln2b_ref,
                        w1_ref, b1_ref, w2_ref, b2_ref,
                        wi_ref, o_ref, x_sc):
    layer = pl.program_id(1)
    MROWS = BATCH_BLOCK * S

    # ---- layer 0: patch embedding (im2col matmul) + positional embedding ----
    # Also initializes the VMEM-resident activation accumulator (scratch is
    # uninitialized otherwise -- must happen under layer == 0 for every batch
    # block before any read).
    @pl.when(layer == 0)
    def _():
        p = patches_ref[...].reshape(MROWS, KP)            # bf16, lane-dense
        x0 = jnp.dot(p, pw_ref[...], preferred_element_type=jnp.float32)
        x0 = x0 + pb_ref[...]
        pos = pos_ref[...]
        if BATCH_BLOCK > 1:
            pos = jnp.concatenate([pos] * BATCH_BLOCK, axis=0)
        x_sc[...] = x0 + pos                                # (MROWS, D) f32

    # ---- one encoder layer per grid step (weights streamed per layer) ----
    x = x_sc[...]

    def layernorm(x, g_ref, b_ref):
        # one-pass variance E[x^2] - mu^2, gamma folded into the rsqrt scale
        mu = jnp.mean(x, axis=-1, keepdims=True)
        var = jnp.mean(x * x, axis=-1, keepdims=True) - mu * mu
        return (x - mu) * (jax.lax.rsqrt(var + EPS_LN) * g_ref[...]) + b_ref[...]

    # --- self-attention (pre-LN), fused QKV projection ---
    xb = layernorm(x, ln1g_ref, ln1b_ref).astype(jnp.bfloat16)
    qkv = jnp.dot(xb, wqkv_ref[...],
                  preferred_element_type=jnp.float32) + bqkv_ref[...]
    # static lane slices at 128-multiples are free
    q = qkv[:, 0:D]
    k = qkv[:, D:2 * D]
    v = qkv[:, 2 * D:3 * D]

    inv_sqrt_dh = 1.0 / math.sqrt(DH)
    ctx_imgs = []
    for i in range(BATCH_BLOCK):            # unrolled; attention is per image
        sl = slice(i * S, (i + 1) * S)
        qi = jnp.transpose(q[sl].reshape(S, H, DH), (1, 0, 2)).astype(jnp.bfloat16)
        ki = jnp.transpose(k[sl].reshape(S, H, DH), (1, 0, 2)).astype(jnp.bfloat16)
        vi = jnp.transpose(v[sl].reshape(S, H, DH), (1, 0, 2)).astype(jnp.bfloat16)
        s = jnp.einsum("hqd,hkd->hqk", qi, ki,
                       preferred_element_type=jnp.float32) * inv_sqrt_dh
        s = s - jnp.max(s, axis=-1, keepdims=True)
        p = jnp.exp(s)                                       # f32 stats
        # approximate EUP reciprocal: deliberate (~1e-3 rel err, free slot);
        # use exact division for bit-closer parity with torch softmax.
        p = p * pl.reciprocal(jnp.sum(p, axis=-1, keepdims=True), approx=True)
        ctx = jnp.einsum("hqk,hkd->hqd", p.astype(jnp.bfloat16), vi,
                         preferred_element_type=jnp.float32)  # (H, S, DH)
        ctx_imgs.append(jnp.transpose(ctx, (1, 0, 2)).reshape(S, D))
    ctx_all = ctx_imgs[0] if BATCH_BLOCK == 1 else jnp.concatenate(ctx_imgs, 0)

    attn = jnp.dot(ctx_all.astype(jnp.bfloat16), wo_ref[...],
                   preferred_element_type=jnp.float32) + bo_ref[...]
    x = x + attn

    # --- MLP (pre-LN, gelu_pytorch_tanh) ---
    xn = layernorm(x, ln2g_ref, ln2b_ref).astype(jnp.bfloat16)
    h1 = jnp.dot(xn, w1_ref[...],
                 preferred_element_type=jnp.float32) + b1_ref[...]
    g = 0.5 * h1 * (1.0 + jnp.tanh(0.7978845608028654 *
                                   (h1 + 0.044715 * h1 * h1 * h1)))
    h2 = jnp.dot(g.astype(jnp.bfloat16), w2_ref[...],
                 preferred_element_type=jnp.float32) + b2_ref[...]
    x = x + h2
    x_sc[...] = x

    # ---- last layer: bilinear token resize (bf16 matmul) + L2 normalize ----
    @pl.when(layer == LAYERS - 1)
    def _():
        outs = []
        for i in range(BATCH_BLOCK):
            xi = x[i * S:(i + 1) * S].astype(jnp.bfloat16)
            y = jnp.dot(wi_ref[...], xi,
                        preferred_element_type=jnp.float32)   # (T, D) f32
            # F.normalize(p=2, dim=-1, eps=1e-12): sqrt(1e-24) == 1e-12 clamp.
            inv_norm = jax.lax.rsqrt(
                jnp.maximum(jnp.sum(y * y, axis=-1, keepdims=True), 1e-24))
            outs.append(y * inv_norm)
        o_ref[...] = jnp.stack(outs, axis=0)


# ----------------------------- wrapper -------------------------------
def siglip_fused(patches, params):
    Bn = patches.shape[0]
    assert Bn % BATCH_BLOCK == 0
    nb = Bn // BATCH_BLOCK
    st = params["stacked"]
    weights = [st[key] for key in LAYER_KEYS]
    w_interp = params["w_interp"]
    T = w_interp.shape[0]
    sq = pl.Squeezed()

    def rep(shape):                           # constant-index (never re-DMA'd)
        n = len(shape)
        return pl.BlockSpec(shape, lambda b, l, n=n: (0,) * n)

    def per_layer(shape):                     # streamed one layer per grid step
        rest = tuple(shape[1:])
        return pl.BlockSpec((sq,) + rest,
                            lambda b, l, n=len(rest): (l,) + (0,) * n)

    in_specs = [pl.BlockSpec((BATCH_BLOCK, S, KP), lambda b, l: (b, 0, 0)),
                rep(params["patch_w"].shape),
                rep(params["patch_b"].shape),
                rep(params["pos"].shape)]
    in_specs += [per_layer(w.shape) for w in weights]
    in_specs.append(rep(w_interp.shape))

    args = (patches, params["patch_w"], params["patch_b"], params["pos"],
            *weights, w_interp)

    per_layer_flops = 8 * S * D * D + 4 * S * S * D + 4 * S * D * DM
    flops = Bn * (2 * S * KP * D + LAYERS * per_layer_flops + 2 * T * S * D)
    transc = Bn * LAYERS * (H * S * S + S * DM)
    w_bytes = sum(int(np.prod(w.shape)) * w.dtype.itemsize for w in weights)
    const_bytes = sum(int(np.prod(a.shape)) * a.dtype.itemsize
                      for a in (patches, params["patch_w"], params["patch_b"],
                                params["pos"], w_interp))
    bytes_acc = nb * w_bytes + const_bytes + Bn * T * D * 4

    return pl.pallas_call(
        siglip_fused_kernel,
        out_shape=jax.ShapeDtypeStruct((Bn, T, D), jnp.float32),
        grid=(nb, LAYERS),
        in_specs=in_specs,
        out_specs=pl.BlockSpec((BATCH_BLOCK, T, D), lambda b, l: (b, 0, 0)),
        scratch_shapes=[pltpu.VMEM((BATCH_BLOCK * S, D), jnp.float32)],
        compiler_params=pltpu.CompilerParams(
            dimension_semantics=("parallel", "arbitrary"),
            vmem_limit_bytes=32 * 1024 * 1024),   # explicit budget (v7x-safe)
        cost_estimate=pl.CostEstimate(flops=flops, transcendentals=transc,
                                      bytes_accessed=bytes_acc),
    )(*args)


# ------------------------------- glue --------------------------------
def im2col(images):
    # images: (B, C, IMG, IMG) NCHW -> (B, S, KP) bf16 lane-dense patch rows
    b = images.shape[0]
    x = images.reshape(b, C, GH, PATCH, GW, PATCH)
    x = x.transpose(0, 2, 4, 1, 3, 5).reshape(b, S, K)      # (B, S, C*p*p)
    x = jnp.pad(x, ((0, 0), (0, 0), (0, KP - K)))           # 48 -> 128 lanes
    return x.astype(jnp.bfloat16)                           # halve patch DMA


def _bilinear_1d_matrix(src, dst):
    # Matches F.interpolate(mode='bilinear', align_corners=False) math.
    scale = src / dst
    W = np.zeros((dst, src), np.float32)
    for i in range(dst):
        s = max((i + 0.5) * scale - 0.5, 0.0)
        i0 = min(int(np.floor(s)), src - 1)
        i1 = min(i0 + 1, src - 1)
        l1 = s - i0
        W[i, i0] += 1.0 - l1
        W[i, i1] += l1
    return W


def build_interp_matrix():
    Wh = _bilinear_1d_matrix(GH, TH)
    Ww = _bilinear_1d_matrix(GW, TW)
    return jnp.asarray(np.kron(Wh, Ww), dtype=jnp.float32)  # (TH*TW, GH*GW)


def init_params():
    key = jax.random.PRNGKey(0)
    keys = iter(jax.random.split(key, 64))

    def nrm(shape, scale=0.02):
        return scale * jax.random.normal(next(keys), shape, dtype=jnp.float32)

    layers = []
    for _ in range(LAYERS):
        wq, wk, wv = nrm((D, D)), nrm((D, D)), nrm((D, D))
        layers.append({
            "ln1g": jnp.ones((1, D), jnp.float32),
            "ln1b": jnp.zeros((1, D), jnp.float32),
            # fused (D, 3D) QKV projection: one wide MXU pass per layer
            "wqkv": jnp.concatenate([wq, wk, wv], axis=1),
            "bqkv": jnp.zeros((1, 3 * D), jnp.float32),
            "wo": nrm((D, D)), "bo": jnp.zeros((1, D), jnp.float32),
            "ln2g": jnp.ones((1, D), jnp.float32),
            "ln2b": jnp.zeros((1, D), jnp.float32),
            "w1": nrm((D, DM)), "b1": jnp.zeros((1, DM), jnp.float32),
            "w2": nrm((DM, D)), "b2": jnp.zeros((1, D), jnp.float32),
        })
    stacked = {k: jnp.stack([l[k] for l in layers]) for k in LAYER_KEYS}
    # MXU operand weights in bf16 (halves per-layer weight DMA); biases/LN f32.
    for k in ("wqkv", "wo", "w1", "w2"):
        stacked[k] = stacked[k].astype(jnp.bfloat16)

    # conv weight (D, C, p, p) flattened^T, zero-padded to the lane-dense KP
    patch_w = jnp.pad(nrm((K, D)), ((0, KP - K), (0, 0))).astype(jnp.bfloat16)

    if NUM_TOKENS != S:                                    # mirrors `num_tokens != 729`
        w_interp = build_interp_matrix()
    else:
        w_interp = jnp.eye(S, dtype=jnp.float32)           # no resize, normalize only
    w_interp = w_interp.astype(jnp.bfloat16)               # bf16 resize matmul operand

    return {
        "patch_w": patch_w,
        "patch_b": jnp.zeros((1, D), jnp.float32),
        "pos": nrm((S, D)),
        "w_interp": w_interp,
        "stacked": stacked,
    }


def siglip_encoder_forward(images, params):
    # mirrors SigLIPEncoder.forward
    if images.ndim == 3:
        images = images[None]                              # images.unsqueeze(0)
    patches = im2col(images)
    return siglip_fused(patches, params)                   # (B, NUM_TOKENS, D), unit L2


# --------------------------- pure-JAX ref ----------------------------
def reference_forward(patches, params):
    st = {k: v.astype(jnp.float32) for k, v in params["stacked"].items()}
    x = jnp.einsum("bsk,kd->bsd", patches.astype(jnp.float32),
                   params["patch_w"].astype(jnp.float32))
    x = x + params["patch_b"] + params["pos"]
    scale = 1.0 / math.sqrt(DH)
    Bn = x.shape[0]
    for l in range(LAYERS):
        mu = x.mean(-1, keepdims=True)
        var = ((x - mu) ** 2).mean(-1, keepdims=True)
        xn = (x - mu) * jax.lax.rsqrt(var + EPS_LN) * st["ln1g"][l] + st["ln1b"][l]
        qkv = xn @ st["wqkv"][l] + st["bqkv"][l]
        q = qkv[..., 0:D].reshape(Bn, S, H, DH)
        k = qkv[..., D:2 * D].reshape(Bn, S, H, DH)
        v = qkv[..., 2 * D:3 * D].reshape(Bn, S, H, DH)
        s = jnp.einsum("bqhd,bkhd->bhqk", q, k) * scale
        p = jax.nn.softmax(s, axis=-1)
        ctx = jnp.einsum("bhqk,bkhd->bqhd", p, v).reshape(Bn, S, D)
        x = x + ctx @ st["wo"][l] + st["bo"][l]
        mu = x.mean(-1, keepdims=True)
        var = ((x - mu) ** 2).mean(-1, keepdims=True)
        xn = (x - mu) * jax.lax.rsqrt(var + EPS_LN) * st["ln2g"][l] + st["ln2b"][l]
        h1 = xn @ st["w1"][l] + st["b1"][l]
        g = 0.5 * h1 * (1.0 + jnp.tanh(0.7978845608028654 *
                                       (h1 + 0.044715 * h1 ** 3)))
        x = x + g @ st["w2"][l] + st["b2"][l]
    y = jnp.einsum("ts,bsd->btd", params["w_interp"].astype(jnp.float32), x)
    return y / jnp.maximum(jnp.linalg.norm(y, axis=-1, keepdims=True), 1e-12)


if __name__ == "__main__":
    params = init_params()
    images = jax.random.normal(jax.random.PRNGKey(0), (B, C, IMG, IMG),
                               dtype=jnp.float32)
    out = jax.block_until_ready(siglip_encoder_forward(images, params))
    assert out.shape == (B, NUM_TOKENS, D), out.shape
    norms = jnp.linalg.norm(out, axis=-1)
    assert bool(jnp.all(jnp.abs(norms - 1.0) < 1e-3)), "L2 normalize failed"
    ref = reference_forward(im2col(images), params)
    max_err = float(jnp.max(jnp.abs(out - ref)))
    assert max_err < 5e-2, f"mismatch vs reference: {max_err}"
    print("KERNEL_OK")
</pallas_src>

<mosaic_0001>
module attributes {stable_mosaic.version = 11 : i64} {
  func.func @siglip_fused_kernel(%arg0: i32, %arg1: i32, %arg2: memref<1x16x128xbf16, #tpu.memory_space<vmem>>, %arg3: memref<128x128xbf16, #tpu.memory_space<vmem>>, %arg4: memref<1x128xf32, #tpu.memory_space<vmem>>, %arg5: memref<16x128xf32, #tpu.memory_space<vmem>>, %arg6: memref<1x1x128xf32, #tpu.memory_space<vmem>>, %arg7: memref<1x1x128xf32, #tpu.memory_space<vmem>>, %arg8: memref<1x128x384xbf16, #tpu.memory_space<vmem>>, %arg9: memref<1x1x384xf32, #tpu.memory_space<vmem>>, %arg10: memref<1x128x128xbf16, #tpu.memory_space<vmem>>, %arg11: memref<1x1x128xf32, #tpu.memory_space<vmem>>, %arg12: memref<1x1x128xf32, #tpu.memory_space<vmem>>, %arg13: memref<1x1x128xf32, #tpu.memory_space<vmem>>, %arg14: memref<1x128x256xbf16, #tpu.memory_space<vmem>>, %arg15: memref<1x1x256xf32, #tpu.memory_space<vmem>>, %arg16: memref<1x256x128xbf16, #tpu.memory_space<vmem>>, %arg17: memref<1x1x128xf32, #tpu.memory_space<vmem>>, %arg18: memref<4x16xbf16, #tpu.memory_space<vmem>>, %arg19: memref<1x4x128xf32, #tpu.memory_space<vmem>>, %arg20: memref<16x128xf32, #tpu.memory_space<vmem>>) attributes {dimension_semantics = [#tpu.dimension_semantics<parallel>, #tpu.dimension_semantics<arbitrary>], iteration_bounds = array<i64: 2, 2>, scalar_prefetch = 0 : i64, scratch_operands = 1 : i64, tpu.core_type = #tpu.core_type<tc>, window_params = [{transform_indices = @transform_0, window_bounds = array<i64: 1, 16, 128>}, {pipeline_mode = #tpu.pipeline_mode<synchronous>, transform_indices = @transform_1, window_bounds = array<i64: 128, 128>}, {pipeline_mode = #tpu.pipeline_mode<synchronous>, transform_indices = @transform_2, window_bounds = array<i64: 1, 128>}, {pipeline_mode = #tpu.pipeline_mode<synchronous>, transform_indices = @transform_3, window_bounds = array<i64: 16, 128>}, {transform_indices = @transform_4, window_bounds = array<i64: 1, 1, 128>}, {transform_indices = @transform_5, window_bounds = array<i64: 1, 1, 128>}, {transform_indices = @transform_6, window_bounds = array<i64: 1, 128, 384>}, {transform_indices = @transform_7, window_bounds = array<i64: 1, 1, 384>}, {transform_indices = @transform_8, window_bounds = array<i64: 1, 128, 128>}, {transform_indices = @transform_9, window_bounds = array<i64: 1, 1, 128>}, {transform_indices = @transform_10, window_bounds = array<i64: 1, 1, 128>}, {transform_indices = @transform_11, window_bounds = array<i64: 1, 1, 128>}, {transform_indices = @transform_12, window_bounds = array<i64: 1, 128, 256>}, {transform_indices = @transform_13, window_bounds = array<i64: 1, 1, 256>}, {transform_indices = @transform_14, window_bounds = array<i64: 1, 256, 128>}, {transform_indices = @transform_15, window_bounds = array<i64: 1, 1, 128>}, {pipeline_mode = #tpu.pipeline_mode<synchronous>, transform_indices = @transform_16, window_bounds = array<i64: 4, 16>}, {transform_indices = @transform_17, window_bounds = array<i64: 1, 4, 128>}]} {
    %c0_i32 = arith.constant 0 : i32
    %0 = arith.cmpi eq, %arg1, %c0_i32 : i32
    %1 = arith.extui %0 : i1 to i32
    %c0_i32_0 = arith.constant 0 : i32
    %2 = arith.cmpi ne, %1, %c0_i32_0 : i32
    scf.if %2 {
      %c0_63 = arith.constant 0 : index
      %c0_64 = arith.constant 0 : index
      %c0_65 = arith.constant 0 : index
      %136 = vector.load %arg2[%c0_63, %c0_64, %c0_65] : memref<1x16x128xbf16, #tpu.memory_space<vmem>>, vector<1x16x128xbf16>
      %137 = vector.shape_cast %136 : vector<1x16x128xbf16> to vector<16x128xbf16>
      %c0_66 = arith.constant 0 : index
      %c0_67 = arith.constant 0 : index
      %138 = vector.load %arg3[%c0_66, %c0_67] : memref<128x128xbf16, #tpu.memory_space<vmem>>, vector<128x128xbf16>
      %cst_68 = arith.constant dense<0.000000e+00> : vector<16x128xf32>
      %139 = tpu.matmul %137, %138, %cst_68 {dimension_numbers = #tpu.dot_dimension_numbers<[1], [0], [0], [1], [0, 0, 1, 1], [], []>} : vector<16x128xbf16>, vector<128x128xbf16>, vector<16x128xf32> -> vector<16x128xf32>
      %c0_69 = arith.constant 0 : index
      %c0_70 = arith.constant 0 : index
      %140 = vector.load %arg4[%c0_69, %c0_70] : memref<1x128xf32, #tpu.memory_space<vmem>>, vector<1x128xf32>
      %141 = vector.broadcast %140 : vector<1x128xf32> to vector<16x128xf32>
      %142 = arith.addf %139, %141 : vector<16x128xf32>
      %c0_71 = arith.constant 0 : index
      %c0_72 = arith.constant 0 : index
      %143 = vector.load %arg5[%c0_71, %c0_72] : memref<16x128xf32, #tpu.memory_space<vmem>>, vector<16x128xf32>
      %144 = arith.addf %142, %143 : vector<16x128xf32>
      %c0_73 = arith.constant 0 : index
      %c0_74 = arith.constant 0 : index
      %145 = vector.load %arg20[%c0_73, %c0_74] : memref<16x128xf32, #tpu.memory_space<vmem>>, vector<16x128xf32>
      tpu.vector_store %arg20[%c0_73, %c0_74], %144 {strides = array<i32>} : memref<16x128xf32, #tpu.memory_space<vmem>>, vector<16x128xf32>,
    } else {
    }
    %c0 = arith.constant 0 : index
    %c0_1 = arith.constant 0 : index
    %3 = vector.load %arg20[%c0, %c0_1] : memref<16x128xf32, #tpu.memory_space<vmem>>, vector<16x128xf32>
    %cst = arith.constant dense<0.000000e+00> : vector<16xf32>
    %4 = vector.multi_reduction <add>, %3, %cst [1] : vector<16x128xf32> to vector<16xf32>
    %5 = vector.shape_cast %4 : vector<16xf32> to vector<16x1xf32>
    %cst_2 = arith.constant 1.280000e+02 : f32
    %6 = vector.broadcast %cst_2 : f32 to vector<16x1xf32>
    %7 = arith.divf %5, %6 : vector<16x1xf32>
    %8 = arith.mulf %3, %3 : vector<16x128xf32>
    %cst_3 = arith.constant dense<0.000000e+00> : vector<16xf32>
    %9 = vector.multi_reduction <add>, %8, %cst_3 [1] : vector<16x128xf32> to vector<16xf32>
    %10 = vector.shape_cast %9 : vector<16xf32> to vector<16x1xf32>
    %cst_4 = arith.constant 1.280000e+02 : f32
    %11 = vector.broadcast %cst_4 : f32 to vector<16x1xf32>
    %12 = arith.divf %10, %11 : vector<16x1xf32>
    %13 = arith.mulf %7, %7 : vector<16x1xf32>
    %14 = arith.subf %12, %13 : vector<16x1xf32>
    %15 = vector.broadcast %7 : vector<16x1xf32> to vector<16x128xf32>
    %16 = arith.subf %3, %15 : vector<16x128xf32>
    %cst_5 = arith.constant 9.99999997E-7 : f32
    %17 = vector.broadcast %cst_5 : f32 to vector<16x1xf32>
    %18 = arith.addf %14, %17 : vector<16x1xf32>
    %19 = math.rsqrt %18 : vector<16x1xf32>
    %c0_6 = arith.constant 0 : index
    %c0_7 = arith.constant 0 : index
    %c0_8 = arith.constant 0 : index
    %20 = vector.load %arg6[%c0_6, %c0_7, %c0_8] : memref<1x1x128xf32, #tpu.memory_space<vmem>>, vector<1x1x128xf32>
    %21 = vector.shape_cast %20 : vector<1x1x128xf32> to vector<1x128xf32>
    %22 = vector.broadcast %19 : vector<16x1xf32> to vector<16x128xf32>
    %23 = vector.broadcast %21 : vector<1x128xf32> to vector<16x128xf32>
    %24 = arith.mulf %22, %23 : vector<16x128xf32>
    %25 = arith.mulf %16, %24 : vector<16x128xf32>
    %c0_9 = arith.constant 0 : index
    %c0_10 = arith.constant 0 : index
    %c0_11 = arith.constant 0 : index
    %26 = vector.load %arg7[%c0_9, %c0_10, %c0_11] : memref<1x1x128xf32, #tpu.memory_space<vmem>>, vector<1x1x128xf32>
    %27 = vector.shape_cast %26 : vector<1x1x128xf32> to vector<1x128xf32>
    %28 = vector.broadcast %27 : vector<1x128xf32> to vector<16x128xf32>
    %29 = arith.addf %25, %28 : vector<16x128xf32>
    %30 = arith.truncf %29 : vector<16x128xf32> to vector<16x128xbf16>
    %c0_12 = arith.constant 0 : index
    %c0_13 = arith.constant 0 : index
    %c0_14 = arith.constant 0 : index
    %31 = vector.load %arg8[%c0_12, %c0_13, %c0_14] : memref<1x128x384xbf16, #tpu.memory_space<vmem>>, vector<1x128x384xbf16>
    %32 = vector.shape_cast %31 : vector<1x128x384xbf16> to vector<128x384xbf16>
    %cst_15 = arith.constant dense<0.000000e+00> : vector<16x384xf32>
    %33 = tpu.matmul %30, %32, %cst_15 {dimension_numbers = #tpu.dot_dimension_numbers<[1], [0], [0], [1], [0, 0, 1, 1], [], []>} : vector<16x128xbf16>, vector<128x384xbf16>, vector<16x384xf32> -> vector<16x384xf32>
    %c0_16 = arith.constant 0 : index
    %c0_17 = arith.constant 0 : index
    %c0_18 = arith.constant 0 : index
    %34 = vector.load %arg9[%c0_16, %c0_17, %c0_18] : memref<1x1x384xf32, #tpu.memory_space<vmem>>, vector<1x1x384xf32>
    %35 = vector.shape_cast %34 : vector<1x1x384xf32> to vector<1x384xf32>
    %36 = vector.broadcast %35 : vector<1x384xf32> to vector<16x384xf32>
    %37 = arith.addf %33, %36 : vector<16x384xf32>
    %38 = vector.extract_strided_slice %37 {offsets = [0, 0], sizes = [16, 128], strides = [1, 1]} : vector<16x384xf32> to vector<16x128xf32>
    %39 = vector.extract_strided_slice %37 {offsets = [0, 128], sizes = [16, 128], strides = [1, 1]} : vector<16x384xf32> to vector<16x128xf32>
    %40 = vector.extract_strided_slice %37 {offsets = [0, 256], sizes = [16, 128], strides = [1, 1]} : vector<16x384xf32> to vector<16x128xf32>
    %41 = vector.shape_cast %38 : vector<16x128xf32> to vector<16x4x32xf32>
    %42 = tpu.transpose %41, [1, 0, 2] : vector<16x4x32xf32> -> vector<4x16x32xf32>
    %43 = arith.truncf %42 : vector<4x16x32xf32> to vector<4x16x32xbf16>
    %44 = vector.shape_cast %39 : vector<16x128xf32> to vector<16x4x32xf32>
    %45 = tpu.transpose %44, [1, 0, 2] : vector<16x4x32xf32> -> vector<4x16x32xf32>
    %46 = arith.truncf %45 : vector<4x16x32xf32> to vector<4x16x32xbf16>
    %47 = vector.shape_cast %40 : vector<16x128xf32> to vector<16x4x32xf32>
    %48 = tpu.transpose %47, [1, 0, 2] : vector<16x4x32xf32> -> vector<4x16x32xf32>
    %49 = arith.truncf %48 : vector<4x16x32xf32> to vector<4x16x32xbf16>
    "tpu.trace_start"() <{level = 10 : i32, message = "hqd,hkd->hqk"}> : () -> ()
    %cst_19 = arith.constant dense<0.000000e+00> : vector<4x16x16xf32>
    %50 = tpu.matmul %43, %46, %cst_19 {dimension_numbers = #tpu.dot_dimension_numbers<[2], [2], [1], [1], [0, 0, 0, 1, 1, 1], [0], [0]>} : vector<4x16x32xbf16>, vector<4x16x32xbf16>, vector<4x16x16xf32> -> vector<4x16x16xf32>
    "tpu.trace_stop"() : () -> ()
    %cst_20 = arith.constant 0.176776692 : f32
    %51 = vector.broadcast %cst_20 : f32 to vector<4x16x16xf32>
    %52 = arith.mulf %50, %51 : vector<4x16x16xf32>
    %cst_21 = arith.constant dense<0xFF800000> : vector<4x16xf32>
    %53 = vector.multi_reduction <maximumf>, %52, %cst_21 [2] : vector<4x16x16xf32> to vector<4x16xf32>
    %54 = vector.shape_cast %53 : vector<4x16xf32> to vector<4x16x1xf32>
    %55 = vector.broadcast %54 : vector<4x16x1xf32> to vector<4x16x16xf32>
    %56 = arith.subf %52, %55 : vector<4x16x16xf32>
    %57 = math.exp %56 : vector<4x16x16xf32>
    %cst_22 = arith.constant dense<0.000000e+00> : vector<4x16xf32>
    %58 = vector.multi_reduction <add>, %57, %cst_22 [2] : vector<4x16x16xf32> to vector<4x16xf32>
    %59 = vector.shape_cast %58 : vector<4x16xf32> to vector<4x16x1xf32>
    %60 = tpu.reciprocal %59 {approx = true} : vector<4x16x1xf32> -> vector<4x16x1xf32>
    %61 = vector.broadcast %60 : vector<4x16x1xf32> to vector<4x16x16xf32>
    %62 = arith.mulf %57, %61 : vector<4x16x16xf32>
    %63 = arith.truncf %62 : vector<4x16x16xf32> to vector<4x16x16xbf16>
    "tpu.trace_start"() <{level = 10 : i32, message = "hqk,hkd->hqd"}> : () -> ()
    %cst_23 = arith.constant dense<0.000000e+00> : vector<4x16x32xf32>
    %64 = tpu.matmul %63, %49, %cst_23 {dimension_numbers = #tpu.dot_dimension_numbers<[2], [1], [1], [2], [0, 0, 0, 1, 1, 2], [0], [0]>} : vector<4x16x16xbf16>, vector<4x16x32xbf16>, vector<4x16x32xf32> -> vector<4x16x32xf32>
    "tpu.trace_stop"() : () -> ()
    %65 = tpu.transpose %64, [1, 0, 2] : vector<4x16x32xf32> -> vector<16x4x32xf32>
    %66 = vector.shape_cast %65 : vector<16x4x32xf32> to vector<16x128xf32>
    %67 = arith.truncf %66 : vector<16x128xf32> to vector<16x128xbf16>
    %c0_24 = arith.constant 0 : index
    %c0_25 = arith.constant 0 : index
    %c0_26 = arith.constant 0 : index
    %68 = vector.load %arg10[%c0_24, %c0_25, %c0_26] : memref<1x128x128xbf16, #tpu.memory_space<vmem>>, vector<1x128x128xbf16>
    %69 = vector.shape_cast %68 : vector<1x128x128xbf16> to vector<128x128xbf16>
    %cst_27 = arith.constant dense<0.000000e+00> : vector<16x128xf32>
    %70 = tpu.matmul %67, %69, %cst_27 {dimension_numbers = #tpu.dot_dimension_numbers<[1], [0], [0], [1], [0, 0, 1, 1], [], []>} : vector<16x128xbf16>, vector<128x128xbf16>, vector<16x128xf32> -> vector<16x128xf32>
    %c0_28 = arith.constant 0 : index
    %c0_29 = arith.constant 0 : index
    %c0_30 = arith.constant 0 : index
    %71 = vector.load %arg11[%c0_28, %c0_29, %c0_30] : memref<1x1x128xf32, #tpu.memory_space<vmem>>, vector<1x1x128xf32>
    %72 = vector.shape_cast %71 : vector<1x1x128xf32> to vector<1x128xf32>
    %73 = vector.broadcast %72 : vector<1x128xf32> to vector<16x128xf32>
    %74 = arith.addf %70, %73 : vector<16x128xf32>
    %75 = arith.addf %3, %74 : vector<16x128xf32>
    %cst_31 = arith.constant dense<0.000000e+00> : vector<16xf32>
    %76 = vector.multi_reduction <add>, %75, %cst_31 [1] : vector<16x128xf32> to vector<16xf32>
    %77 = vector.shape_cast %76 : vector<16xf32> to vector<16x1xf32>
    %cst_32 = arith.constant 1.280000e+02 : f32
    %78 = vector.broadcast %cst_32 : f32 to vector<16x1xf32>
    %79 = arith.divf %77, %78 : vector<16x1xf32>
    %80 = arith.mulf %75, %75 : vector<16x128xf32>
    %cst_33 = arith.constant dense<0.000000e+00> : vector<16xf32>
    %81 = vector.multi_reduction <add>, %80, %cst_33 [1] : vector<16x128xf32> to vector<16xf32>
    %82 = vector.shape_cast %81 : vector<16xf32> to vector<16x1xf32>
    %cst_34 = arith.constant 1.280000e+02 : f32
    %83 = vector.broadcast %cst_34 : f32 to vector<16x1xf32>
    %84 = arith.divf %82, %83 : vector<16x1xf32>
    %85 = arith.mulf %79, %79 : vector<16x1xf32>
    %86 = arith.subf %84, %85 : vector<16x1xf32>
    %87 = vector.broadcast %79 : vector<16x1xf32> to vector<16x128xf32>
    %88 = arith.subf %75, %87 : vector<16x128xf32>
    %cst_35 = arith.constant 9.99999997E-7 : f32
    %89 = vector.broadcast %cst_35 : f32 to vector<16x1xf32>
    %90 = arith.addf %86, %89 : vector<16x1xf32>
    %91 = math.rsqrt %90 : vector<16x1xf32>
    %c0_36 = arith.constant 0 : index
    %c0_37 = arith.constant 0 : index
    %c0_38 = arith.constant 0 : index
    %92 = vector.load %arg12[%c0_36, %c0_37, %c0_38] : memref<1x1x128xf32, #tpu.memory_space<vmem>>, vector<1x1x128xf32>
    %93 = vector.shape_cast %92 : vector<1x1x128xf32> to vector<1x128xf32>
    %94 = vector.broadcast %91 : vector<16x1xf32> to vector<16x128xf32>
    %95 = vector.broadcast %93 : vector<1x128xf32> to vector<16x128xf32>
    %96 = arith.mulf %94, %95 : vector<16x128xf32>
    %97 = arith.mulf %88, %96 : vector<16x128xf32>
    %c0_39 = arith.constant 0 : index
    %c0_40 = arith.constant 0 : index
    %c0_41 = arith.constant 0 : index
    %98 = vector.load %arg13[%c0_39, %c0_40, %c0_41] : memref<1x1x128xf32, #tpu.memory_space<vmem>>, vector<1x1x128xf32>
    %99 = vector.shape_cast %98 : vector<1x1x128xf32> to vector<1x128xf32>
    %100 = vector.broadcast %99 : vector<1x128xf32> to vector<16x128xf32>
    %101 = arith.addf %97, %100 : vector<16x128xf32>
    %102 = arith.truncf %101 : vector<16x128xf32> to vector<16x128xbf16>
    %c0_42 = arith.constant 0 : index
    %c0_43 = arith.constant 0 : index
    %c0_44 = arith.constant 0 : index
    %103 = vector.load %arg14[%c0_42, %c0_43, %c0_44] : memref<1x128x256xbf16, #tpu.memory_space<vmem>>, vector<1x128x256xbf16>
    %104 = vector.shape_cast %103 : vector<1x128x256xbf16> to vector<128x256xbf16>
    %cst_45 = arith.constant dense<0.000000e+00> : vector<16x256xf32>
    %105 = tpu.matmul %102, %104, %cst_45 {dimension_numbers = #tpu.dot_dimension_numbers<[1], [0], [0], [1], [0, 0, 1, 1], [], []>} : vector<16x128xbf16>, vector<128x256xbf16>, vector<16x256xf32> -> vector<16x256xf32>
    %c0_46 = arith.constant 0 : index
    %c0_47 = arith.constant 0 : index
    %c0_48 = arith.constant 0 : index
    %106 = vector.load %arg15[%c0_46, %c0_47, %c0_48] : memref<1x1x256xf32, #tpu.memory_space<vmem>>, vector<1x1x256xf32>
    %107 = vector.shape_cast %106 : vector<1x1x256xf32> to vector<1x256xf32>
    %108 = vector.broadcast %107 : vector<1x256xf32> to vector<16x256xf32>
    %109 = arith.addf %105, %108 : vector<16x256xf32>
    %cst_49 = arith.constant 5.000000e-01 : f32
    %110 = vector.broadcast %cst_49 : f32 to vector<16x256xf32>
    %111 = arith.mulf %110, %109 : vector<16x256xf32>
    %cst_50 = arith.constant 4.471500e-02 : f32
    %112 = vector.broadcast %cst_50 : f32 to vector<16x256xf32>
    %113 = arith.mulf %112, %109 : vector<16x256xf32>
    %114 = arith.mulf %113, %109 : vector<16x256xf32>
    %115 = arith.mulf %114, %109 : vector<16x256xf32>
    %116 = arith.addf %109, %115 : vector<16x256xf32>
    %cst_51 = arith.constant 0.797884583 : f32
    %117 = vector.broadcast %cst_51 : f32 to vector<16x256xf32>
    %118 = arith.mulf %117, %116 : vector<16x256xf32>
    %119 = math.tanh %118 : vector<16x256xf32>
    %cst_52 = arith.constant 1.000000e+00 : f32
    %120 = vector.broadcast %cst_52 : f32 to vector<16x256xf32>
    %121 = arith.addf %120, %119 : vector<16x256xf32>
    %122 = arith.mulf %111, %121 : vector<16x256xf32>
    %123 = arith.truncf %122 : vector<16x256xf32> to vector<16x256xbf16>
    %c0_53 = arith.constant 0 : index
    %c0_54 = arith.constant 0 : index
    %c0_55 = arith.constant 0 : index
    %124 = vector.load %arg16[%c0_53, %c0_54, %c0_55] : memref<1x256x128xbf16, #tpu.memory_space<vmem>>, vector<1x256x128xbf16>
    %125 = vector.shape_cast %124 : vector<1x256x128xbf16> to vector<256x128xbf16>
    %cst_56 = arith.constant dense<0.000000e+00> : vector<16x128xf32>
    %126 = tpu.matmul %123, %125, %cst_56 {dimension_numbers = #tpu.dot_dimension_numbers<[1], [0], [0], [1], [0, 0, 1, 1], [], []>} : vector<16x256xbf16>, vector<256x128xbf16>, vector<16x128xf32> -> vector<16x128xf32>
    %c0_57 = arith.constant 0 : index
    %c0_58 = arith.constant 0 : index
    %c0_59 = arith.constant 0 : index
    %127 = vector.load %arg17[%c0_57, %c0_58, %c0_59] : memref<1x1x128xf32, #tpu.memory_space<vmem>>, vector<1x1x128xf32>
    %128 = vector.shape_cast %127 : vector<1x1x128xf32> to vector<1x128xf32>
    %129 = vector.broadcast %128 : vector<1x128xf32> to vector<16x128xf32>
    %130 = arith.addf %126, %129 : vector<16x128xf32>
    %131 = arith.addf %75, %130 : vector<16x128xf32>
    %c0_60 = arith.constant 0 : index
    %c0_61 = arith.constant 0 : index
    %132 = vector.load %arg20[%c0_60, %c0_61] : memref<16x128xf32, #tpu.memory_space<vmem>>, vector<16x128xf32>
    tpu.vector_store %arg20[%c0_60, %c0_61], %131 {strides = array<i32>} : memref<16x128xf32, #tpu.memory_space<vmem>>, vector<16x128xf32>,
    %c1_i32 = arith.constant 1 : i32
    %133 = arith.cmpi eq, %arg1, %c1_i32 : i32
    %134 = arith.extui %133 : i1 to i32
    %c0_i32_62 = arith.constant 0 : i32
    %135 = arith.cmpi ne, %134, %c0_i32_62 : i32
    scf.if %135 {
      %136 = arith.truncf %131 : vector<16x128xf32> to vector<16x128xbf16>
      %c0_63 = arith.constant 0 : index
      %c0_64 = arith.constant 0 : index
      %137 = vector.load %arg18[%c0_63, %c0_64] : memref<4x16xbf16, #tpu.memory_space<vmem>>, vector<4x16xbf16>
      %cst_65 = arith.constant dense<0.000000e+00> : vector<4x128xf32>
      %138 = tpu.matmul %137, %136, %cst_65 {dimension_numbers = #tpu.dot_dimension_numbers<[1], [0], [0], [1], [0, 0, 1, 1], [], []>} : vector<4x16xbf16>, vector<16x128xbf16>, vector<4x128xf32> -> vector<4x128xf32>
      %139 = arith.mulf %138, %138 : vector<4x128xf32>
      %cst_66 = arith.constant dense<0.000000e+00> : vector<4xf32>
      %140 = vector.multi_reduction <add>, %139, %cst_66 [1] : vector<4x128xf32> to vector<4xf32>
      %141 = vector.shape_cast %140 : vector<4xf32> to vector<4x1xf32>
      %cst_67 = arith.constant 1.000000e-24 : f32
      %142 = vector.broadcast %cst_67 : f32 to vector<4x1xf32>
      %143 = arith.maximumf %141, %142 : vector<4x1xf32>
      %144 = math.rsqrt %143 : vector<4x1xf32>
      %145 = vector.broadcast %144 : vector<4x1xf32> to vector<4x128xf32>
      %146 = arith.mulf %138, %145 : vector<4x128xf32>
      %147 = vector.shape_cast %146 : vector<4x128xf32> to vector<1x4x128xf32>
      %c0_68 = arith.constant 0 : index
      %c0_69 = arith.constant 0 : index
      %c0_70 = arith.constant 0 : index
      %148 = vector.load %arg19[%c0_68, %c0_69, %c0_70] : memref<1x4x128xf32, #tpu.memory_space<vmem>>, vector<1x4x128xf32>
      tpu.vector_store %arg19[%c0_68, %c0_69, %c0_70], %147 {strides = array<i32>} : memref<1x4x128xf32, #tpu.memory_space<vmem>>, vector<1x4x128xf32>,
    } else {
    }
    return
  }
  func.func @transform_0(%arg0: i32, %arg1: i32) -> (i32, i32, i32) {
    %c0_i32 = arith.constant 0 : i32
    %c0_i32_0 = arith.constant 0 : i32
    %c0_i32_1 = arith.constant 0 : i32
    return %arg0, %c0_i32, %c0_i32_0 : i32, i32, i32
  }
  func.func @transform_1(%arg0: i32, %arg1: i32) -> (i32, i32) {
    %c0_i32 = arith.constant 0 : i32
    %c0_i32_0 = arith.constant 0 : i32
    %c0_i32_1 = arith.constant 0 : i32
    return %c0_i32, %c0_i32_0 : i32, i32
  }
  func.func @transform_2(%arg0: i32, %arg1: i32) -> (i32, i32) {
    %c0_i32 = arith.constant 0 : i32
    %c0_i32_0 = arith.constant 0 : i32
    %c0_i32_1 = arith.constant 0 : i32
    return %c0_i32, %c0_i32_0 : i32, i32
  }
  func.func @transform_3(%arg0: i32, %arg1: i32) -> (i32, i32) {
    %c0_i32 = arith.constant 0 : i32
    %c0_i32_0 = arith.constant 0 : i32
    %c0_i32_1 = arith.constant 0 : i32
    return %c0_i32, %c0_i32_0 : i32, i32
  }
  func.func @transform_4(%arg0: i32, %arg1: i32) -> (i32, i32, i32) {
    %c0_i32 = arith.constant 0 : i32
    %c0_i32_0 = arith.constant 0 : i32
    %c0_i32_1 = arith.constant 0 : i32
    return %arg1, %c0_i32, %c0_i32_0 : i32, i32, i32
  }
  func.func @transform_5(%arg0: i32, %arg1: i32) -> (i32, i32, i32) {
    %c0_i32 = arith.constant 0 : i32
    %c0_i32_0 = arith.constant 0 : i32
    %c0_i32_1 = arith.constant 0 : i32
    return %arg1, %c0_i32, %c0_i32_0 : i32, i32, i32
  }
  func.func @transform_6(%arg0: i32, %arg1: i32) -> (i32, i32, i32) {
    %c0_i32 = arith.constant 0 : i32
    %c0_i32_0 = arith.constant 0 : i32
    %c0_i32_1 = arith.constant 0 : i32
    return %arg1, %c0_i32, %c0_i32_0 : i32, i32, i32
  }
  func.func @transform_7(%arg0: i32, %arg1: i32) -> (i32, i32, i32) {
    %c0_i32 = arith.constant 0 : i32
    %c0_i32_0 = arith.constant 0 : i32
    %c0_i32_1 = arith.constant 0 : i32
    return %arg1, %c0_i32, %c0_i32_0 : i32, i32, i32
  }
  func.func @transform_8(%arg0: i32, %arg1: i32) -> (i32, i32, i32) {
    %c0_i32 = arith.constant 0 : i32
    %c0_i32_0 = arith.constant 0 : i32
    %c0_i32_1 = arith.constant 0 : i32
    return %arg1, %c0_i32, %c0_i32_0 : i32, i32, i32
  }
  func.func @transform_9(%arg0: i32, %arg1: i32) -> (i32, i32, i32) {
    %c0_i32 = arith.constant 0 : i32
    %c0_i32_0 = arith.constant 0 : i32
    %c0_i32_1 = arith.constant 0 : i32
    return %arg1, %c0_i32, %c0_i32_0 : i32, i32, i32
  }
  func.func @transform_10(%arg0: i32, %arg1: i32) -> (i32, i32, i32) {
    %c0_i32 = arith.constant 0 : i32
    %c0_i32_0 = arith.constant 0 : i32
    %c0_i32_1 = arith.constant 0 : i32
    return %arg1, %c0_i32, %c0_i32_0 : i32, i32, i32
  }
  func.func @transform_11(%arg0: i32, %arg1: i32) -> (i32, i32, i32) {
    %c0_i32 = arith.constant 0 : i32
    %c0_i32_0 = arith.constant 0 : i32
    %c0_i32_1 = arith.constant 0 : i32
    return %arg1, %c0_i32, %c0_i32_0 : i32, i32, i32
  }
  func.func @transform_12(%arg0: i32, %arg1: i32) -> (i32, i32, i32) {
    %c0_i32 = arith.constant 0 : i32
    %c0_i32_0 = arith.constant 0 : i32
    %c0_i32_1 = arith.constant 0 : i32
    return %arg1, %c0_i32, %c0_i32_0 : i32, i32, i32
  }
  func.func @transform_13(%arg0: i32, %arg1: i32) -> (i32, i32, i32) {
    %c0_i32 = arith.constant 0 : i32
    %c0_i32_0 = arith.constant 0 : i32
    %c0_i32_1 = arith.constant 0 : i32
    return %arg1, %c0_i32, %c0_i32_0 : i32, i32, i32
  }
  func.func @transform_14(%arg0: i32, %arg1: i32) -> (i32, i32, i32) {
    %c0_i32 = arith.constant 0 : i32
    %c0_i32_0 = arith.constant 0 : i32
    %c0_i32_1 = arith.constant 0 : i32
    return %arg1, %c0_i32, %c0_i32_0 : i32, i32, i32
  }
  func.func @transform_15(%arg0: i32, %arg1: i32) -> (i32, i32, i32) {
    %c0_i32 = arith.constant 0 : i32
    %c0_i32_0 = arith.constant 0 : i32
    %c0_i32_1 = arith.constant 0 : i32
    return %arg1, %c0_i32, %c0_i32_0 : i32, i32, i32
  }
  func.func @transform_16(%arg0: i32, %arg1: i32) -> (i32, i32) {
    %c0_i32 = arith.constant 0 : i32
    %c0_i32_0 = arith.constant 0 : i32
    %c0_i32_1 = arith.constant 0 : i32
    return %c0_i32, %c0_i32_0 : i32, i32
  }
  func.func @transform_17(%arg0: i32, %arg1: i32) -> (i32, i32, i32) {
    %c0_i32 = arith.constant 0 : i32
    %c0_i32_0 = arith.constant 0 : i32
    %c0_i32_1 = arith.constant 0 : i32
    return %arg0, %c0_i32, %c0_i32_0 : i32, i32, i32
  }
}

</mosaic_0001>

<bundles_post_ra>
// kernel: tpu_custom_call.1
= control target key start
LH: loop header
LB: loop body
LE: loop exit
PB: predicated region body
PF: predicated region fallthrough
CT: control target
= control target key end

     0   :  { %s6055_s0 = inlined_call_operand.hbm [shape: bf16[2,16,128], index: 0, kind: input, shape index: {}]   ;;  %s6056_s1 = inlined_call_operand.hbm [shape: bf16[128,128], index: 1, kind: input, shape index: {}]   ;;  %s6057_s2 = inlined_call_operand.hbm [shape: f32[1,128], index: 2, kind: input, shape index: {}]   ;;  %s6058_s3 = inlined_call_operand.hbm [shape: f32[16,128], index: 3, kind: input, shape index: {}]   ;;  %s6059_s4 = inlined_call_operand.vmem [shape: f32[2,1,128], index: 4, kind: input, shape index: {}]   ;;  %s6060_s5 = inlined_call_operand.vmem [shape: f32[2,1,128], index: 5, kind: input, shape index: {}]   ;;  %s6061_s6 = inlined_call_operand.hbm [shape: bf16[2,128,384], index: 6, kind: input, shape index: {}]   ;;  %s6062_s7 = inlined_call_operand.vmem [shape: f32[2,1,384], index: 7, kind: input, shape index: {}]   ;;  %s6063_s8 = inlined_call_operand.hbm [shape: bf16[2,128,128], index: 8, kind: input, shape index: {}]   ;;  %s6064_s9 = inlined_call_operand.vmem [shape: f32[2,1,128], index: 9, kind: input, shape index: {}]   ;;  %s6065_s10 = inlined_call_operand.vmem [shape: f32[2,1,128], index: 10, kind: input, shape index: {}]   ;;  %s6066_s11 = inlined_call_operand.vmem [shape: f32[2,1,128], index: 11, kind: input, shape index: {}]   ;;  %s6067_s12 = inlined_call_operand.hbm [shape: bf16[2,128,256], index: 12, kind: input, shape index: {}]   ;;  %s6068_s13 = inlined_call_operand.vmem [shape: f32[2,1,256], index: 13, kind: input, shape index: {}]   ;;  %s6069_s14 = inlined_call_operand.hbm [shape: bf16[2,256,128], index: 14, kind: input, shape index: {}]   ;;  %s6070_s15 = inlined_call_operand.vmem [shape: f32[2,1,128], index: 15, kind: input, shape index: {}]   ;;  %s6071_s16 = inlined_call_operand.vmem [shape: bf16[4,16], index: 16, kind: input, shape index: {}]   ;;  %s6072_s17 = inlined_call_operand.hbm [shape: f32[2,4,128], index: 17, kind: output, shape index: {}]  }
   0x1   :  { %6114 = sst [smem:[#allocation38_spill]] %s6055_s0 }
   0x2   :  { %6115 = sst [smem:[#allocation39_spill]] %s6056_s1 }
   0x3   :  { %6116 = sst [smem:[#allocation40_spill]] %s6057_s2 }
   0x4   :  { %6117 = sst [smem:[#allocation41_spill]] %s6058_s3 }
   0x5   :  { %6118 = sst [smem:[#allocation42_spill]] %s6059_s4 }
   0x6   :  { %6119 = sst [smem:[#allocation43_spill]] %s6060_s5 }
   0x7   :  { %6120 = sst [smem:[#allocation44_spill]] %s6061_s6 }
   0x8   :  { %6121 = sst [smem:[#allocation45_spill]] %s6062_s7 }
   0x9   :  { %6122 = sst [smem:[#allocation46_spill]] %s6063_s8 }
   0xa   :  { %6123 = sst [smem:[#allocation47_spill]] %s6064_s9 }
   0xb   :  { %6124 = sst [smem:[#allocation48_spill]] %s6065_s10 }
   0xc   :  { %6125 = sst [smem:[#allocation49_spill]] %s6066_s11 }
   0xd   :  { %6126 = sst [smem:[#allocation50_spill]] %s6067_s12 }
   0xe   :  { %6127 = sst [smem:[#allocation51_spill]] %s6068_s13 }
   0xf   :  { %6128 = sst [smem:[#allocation52_spill]] %s6069_s14 }
  0x10   :  { %6129 = sst [smem:[#allocation53_spill]] %s6070_s15 }
  0x11   :  { %6130 = sst [smem:[#allocation54_spill]] %s6071_s16 }
  0x12   :  { %6131 = sst [smem:[#allocation55_spill]] %s6072_s17 }
  0x13   :  { %22 = vsyncpa [#allocation4], 0 }
  0x14   :  { %24 = vsyncpa [#allocation4 + $0x1], 0 }
  0x15   :  { %25 = vsyncpa [#allocation7], 0 }
  0x16   :  { %26 = vsyncpa [#allocation10], 0 }
  0x17   :  { %27 = vsyncpa [#allocation5], 0 }
  0x18   :  { %29 = vsyncpa [#allocation5 + $0x1], 0  ;;  %s4998_s24 = smov 0   ;;  %s5000_s25 = smov 0  }
  0x19   :  { %s5002_s26 = smov 0   ;;  %s5004_s27 = smov 0  }
  0x1a   :  { %s5006_s28 = smov 0   ;;  %s5008_s29 = smov 0  }
  0x1b   :  { %s5010_s0 = smov 0   ;;  %s5012_s30 = smov 0  }
  0x1c   :  { %s5014_s18 = smov 0   ;;  %s5016_s19 = smov 0  }
  0x1d   :  { %s5018_s1 = smov 0  }
  0x1e LB: > { %6132 = sst [smem:[#allocation21_spill]] %s4843_s25  ;;  %s44_s20 = sadd.s32 1, %s4871_s18  ;;  %s4879_s1 = sphi %s5018_s1, %s35_s1   ;;  %s4875_s19 = sphi %s5016_s19, %s6230_s19   ;;  %s4871_s18 = sphi %s5014_s18, %s6229_s18   ;;  %s4867_s30 = sphi %s5012_s30, %s6224_s30   ;;  %s4863_s0 = sphi %s5010_s0, %s6223_s0   ;;  %s4859_s29 = sphi %s5008_s29, %s6222_s29   ;;  %s4855_s28 = sphi %s5006_s28, %s6228_s28   ;;  %s4851_s27 = sphi %s5004_s27, %s6227_s27   ;;  %s4847_s26 = sphi %s5002_s26, %s6220_s26   ;;  %s4843_s25 = sphi %s5000_s25, %s6219_s25   ;;  %s4839_s24 = sphi %s4998_s24, %s6218_s24  }
  0x1f   : > { %6133 = sst [smem:[#allocation22_spill]] %s4847_s26  ;;  %s47_s21 = sadd.s32 1, %s4875_s19 }
  0x20   : > { %6134 = sst [smem:[#allocation23_spill]] %s4851_s27  ;;  %p45_p0 = scmp.ge.s32.totalorder %s44_s20, 2 }
  0x21   : > { %6135 = sst [smem:[#allocation24_spill]] %s4859_s29  ;;  %s54_s22 = sadd.s32 1, %s4859_s29 }
  0x22   : > { %6136 = sst [smem:[#allocation25_spill]] %s4863_s0  ;;  %p6079_p1 = scmp.ne.s32.totalorder %s4859_s29, %s4855_s28 }
  0x23   : > { %6137 = sst [smem:[#allocation26_spill]] %s4867_s30  ;;  %p6081_p2 = scmp.eq.s32.totalorder %s4879_s1, 0 }
  0x24   : > { %6138 = sst [smem:[#allocation27_spill]] %s4871_s18  ;;  %s6232_s20 = smov (%p45_p0, %s44_s20), 0 }
  0x25   : > { %6139 = sst [smem:[#allocation28_spill]] %s4875_s19  ;;  %s6234_s21 = smov (!%p45_p0, %s47_s21), %s4875_s19 }
  0x26   : > { %6140 = sst [smem:[#allocation29_spill]] %s4879_s1  ;;  %p5067_p3 = por %p6081_p2, %p6079_p1 }
  0x27   : > { %6141 = sst [smem:[#allocation30_spill]] %s6232_s20  ;;  %s192_s17 = ssub.s32 %s4871_s18, %s6232_s20 }
  0x28   : > { %p49_p4 = scmp.ge.s32.totalorder %s6234_s21, 2  ;;  %p5073_p5 = scmp.eq.s32.totalorder %s192_s17, 0 }
  0x29   : > { %p6080_p6 = scmp.lt.s32.totalorder %s4879_s1, 4  ;;  %s553_s15 = sand.u32 1, %s4879_s1  }
  0x2a   : > { %s6236_s21 = smov (%p49_p4, %s6234_s21), 0  ;;  %s555_s13 = sand.u32 1, %s4859_s29  }
  0x2b   : > { %6144 = sst [smem:[#allocation31_spill]] %s6236_s21  ;;  %s51_s16 = ssub.s32 %s4875_s19, %s6236_s21 }
  0x2c   : > { %p52_p7 = scmp.eq.s32.totalorder %s51_s16, 0  ;;  %s3995_s7 = sshll.u32 %s4875_s19, 7 }
  0x2d   : > { %s3861_s10 = sshll.u32 %s555_s13, 3  ;;  %s6146_s20 = sld [smem:[#allocation38_spill]] }
  0x2e   : > { %s5086_s11 = scalar_select %p52_p7, %s4859_s29, %s54_s22  }
  0x2f   : > { %p5097_p8 = pnand %p6080_p6, %p5067_p3  ;;  %s557_s16 = scalar_lea.vmem [#allocation3], %s3861_s10 }
  0x30   : > { %6145 = sst [smem:[#allocation32_spill]] %s5086_s11  ;;  %s564_s22 = sshll.u32 %s557_s16, 4  ;;  %s5101_s22 = int_to_ptr.vmem [resolvable:$true] %s564_s22 }
  0x31   : > { %s5103_s13 = scalar_lea.sflag [#allocation4], %s553_s15  ;;  %p4513_p10 = pneg %p5097_p8 }
  0x33   : > { %s5091_s4 = scalar_lea.hbm %s6146_s20, %s3995_s7  ;;  %s4516_s23 = scalar_lea.hbm %s6146_s20, 256 }
  0x34   : > { %s4511_s5 = scalar_lea.hbm %s5091_s4, 128  ;;  %p4517_p13 = scmp.lt.u32.totalorder %s5091_s4, %s6146_s20 }
  0x35   : > { %p4512_p9 = scmp.ne.s32.totalorder %s5091_s4, %s4511_s5  ;;  %p4518_p0 = scmp.lt.u32.totalorder %s4516_s23, %s4511_s5 }
  0x36   : > { %p4520_p4 = scmp.lt.u32.totalorder %s4511_s5, %s5091_s4 }
  0x37   : > { %p4514_p11 = pnand %p4513_p10, %p4512_p9  ;;  %p4519_p3 = por %p4518_p0, %p4517_p13 }
  0x39   : > { %p4515_p12 = pneg %p4514_p11  ;;  %p4521_p7 = por %p4520_p4, %p4519_p3 }
  0x3b   : > { %p4522_p1 = pnand %p4521_p7, %p4515_p12 }
  0x3d   : > { %4525 = shalt.err (!%p4522_p1)
}
  0x3e   : > { %s4526_s10 = scalar_lea.vmem %s5101_s22, 128  ;;  %s4881_s15 = smov [#allocation3]  }
  0x3f   : > { %p4527_p9 = scmp.ne.s32.totalorder %s5101_s22, %s4526_s10  ;;  %s4531_s16 = sshll.u32 %s4881_s15, 4  ;;  %s4532_s16 = int_to_ptr.vmem [resolvable:$false] %s4531_s16 }
  0x40   : > { %s4533_s19 = scalar_lea.vmem %s4532_s16, 256  ;;  %p4534_p2 = scmp.lt.s32.totalorder %s5101_s22, %s4532_s16 }
  0x41   : > { %p4529_p11 = pnand %p4527_p9, %p4513_p10  ;;  %p4535_p13 = scmp.lt.s32.totalorder %s4533_s19, %s4526_s10 }
  0x43   : > { %p4530_p6 = pneg %p4529_p11  ;;  %p4536_p0 = por %p4535_p13, %p4534_p2 }
  0x45   : > { %p4537_p3 = pnand %p4536_p0, %p4530_p6 }
  0x47   : > { %4540 = shalt.err (!%p4537_p3)
}
  0x48   : > { %s6082_s21 = smov 64   ;;  %s6084_s5 = smov 4  }
  0x49   : > { %4221 = dma.hbm_to_vmem [thread:$0]  (!%p5097_p8), %s5091_s4, 128, %s5101_s22, %s5103_s13, %s6082_s21, %s6082_s21, %s6084_s5  }
  0x4a   : > { %s4181_s7 = smul.u32 3072, %s4871_s18  ;;  %s195_s9 = sadd.s32 1, %s4847_s26 }
  0x4b   : > { %p202_p1 = scmp.ne.s32.totalorder %s4847_s26, %s4843_s25  ;;  %p6149_p2 = scmp.eq.s32.totalorder %s4879_s1, 0 }
  0x4c   : > { %s5141_s23 = scalar_select %p5073_p5, %s4847_s26, %s195_s9  }
  0x4d   : > { %p204_p6 = por %p202_p1, %p6149_p2  ;;  %s5146_s10 = sand.u32 1, %s4847_s26  }
  0x4e   : > { %6148 = sst [smem:[#allocation33_spill]] %s5141_s23  ;;  %s4180_s15 = smul.u32 192, %s5146_s10 }
  0x4f   : > { %s6150_s6 = sld [smem:[#allocation44_spill]]  ;;  %p6151_p10 = scmp.lt.s32.totalorder %s4879_s1, 4 }
  0x50   : > { %s590_s30 = scalar_lea.vmem [#allocation11], %s4180_s15 }
  0x51   : > { %p5156_p8 = pnand %p6151_p10, %p204_p6  ;;  %s597_s22 = sshll.u32 %s590_s30, 4  ;;  %s5160_s22 = int_to_ptr.vmem [resolvable:$true] %s597_s22 }
  0x53   : > { %s6152_s4 = scalar_select %p5156_p8, 1, 0 }
  0x54   : > { %p5167_p12 = pneg %p5156_p8 }
  0x55   : > { %s5152_s17 = scalar_lea.hbm %s6150_s6, %s4181_s7  ;;  %s4546_s5 = scalar_lea.hbm %s6150_s6, 6144 }
  0x56   : > { %s4541_s21 = scalar_lea.hbm %s5152_s17, 3072  ;;  %p4547_p9 = scmp.lt.u32.totalorder %s5152_s17, %s6150_s6 }
  0x57   : > { %p4542_p5 = scmp.ne.s32.totalorder %s5152_s17, %s4541_s21  ;;  %p4548_p11 = scmp.lt.u32.totalorder %s4546_s5, %s4541_s21 }
  0x58   : > { %p4550_p0 = scmp.lt.u32.totalorder %s4541_s21, %s5152_s17 }
  0x59   : > { %p4544_p4 = pnand %p5167_p12, %p4542_p5  ;;  %p4549_p13 = por %p4548_p11, %p4547_p9 }
  0x5b   : > { %p4545_p7 = pneg %p4544_p4  ;;  %p4551_p3 = por %p4550_p0, %p4549_p13 }
  0x5d   : > { %p4552_p1 = pnand %p4551_p3, %p4545_p7 }
  0x5f   : > { %4555 = shalt.err (!%p4552_p1)
}
  0x60   : > { %s4556_s9 = scalar_lea.vmem %s5160_s22, 3072  ;;  %s4884_s16 = smov [#allocation11]  }
  0x61   : > { %p4557_p2 = scmp.ne.s32.totalorder %s5160_s22, %s4556_s9  ;;  %s4561_s19 = sshll.u32 %s4884_s16, 4  ;;  %s4562_s19 = int_to_ptr.vmem [resolvable:$false] %s4561_s19 }
  0x62   : > { %s4563_s15 = scalar_lea.vmem %s4562_s19, 6144  ;;  %p4564_p5 = scmp.lt.s32.totalorder %s5160_s22, %s4562_s19 }
  0x63   : > { %p4559_p6 = pnand %p4557_p2, %p5167_p12  ;;  %p4565_p4 = scmp.lt.s32.totalorder %s4563_s15, %s4556_s9 }
  0x65   : > { %p4560_p10 = pneg %p4559_p6  ;;  %p4566_p9 = por %p4565_p4, %p4564_p5 }
  0x67   : > { %p4567_p11 = pnand %p4566_p9, %p4560_p10 }
  0x69   : > { %4570 = shalt.err (!%p4567_p11)
}
  0x6a   : > { %s4885_s21 = smov 192   ;;  %s4886_s5 = smov 12  }
  0x6b   : > { %4224 = dma.hbm_to_vmem [thread:$0]  (!%p5156_p8), %s5152_s17, 3072, %s5160_s22, %s5103_s13, %s4885_s21, %s4885_s21, %s4886_s5  }
  0x6c   : > { %s3996_s30 = sshll.u32 %s4871_s18, 10  ;;  %s6154_s8 = sld [smem:[#allocation46_spill]] }
  0x6d   : > { %s6155_s9 = sshll.u32 %s5146_s10, 6 }
  0x6e   : > { %s618_s15 = scalar_lea.vmem [#allocation12], %s6155_s9 }
  0x6f   : > { %s625_s20 = sshll.u32 %s618_s15, 4  ;;  %s5199_s20 = int_to_ptr.vmem [resolvable:$true] %s625_s20 }
  0x72   : > { %s5195_s19 = scalar_lea.hbm %s6154_s8, %s3996_s30  ;;  %s4576_s6 = scalar_lea.hbm %s6154_s8, 2048 }
  0x73   : > { %s4571_s11 = scalar_lea.hbm %s5195_s19, 1024  ;;  %p4577_p3 = scmp.lt.u32.totalorder %s5195_s19, %s6154_s8 }
  0x74   : > { %p4572_p7 = scmp.ne.s32.totalorder %s5195_s19, %s4571_s11  ;;  %p4578_p1 = scmp.lt.u32.totalorder %s4576_s6, %s4571_s11 }
  0x75   : > { %p4580_p6 = scmp.lt.u32.totalorder %s4571_s11, %s5195_s19 }
  0x76   : > { %p4574_p13 = pnand %p4572_p7, %p5167_p12  ;;  %p4579_p2 = por %p4578_p1, %p4577_p3 }
  0x78   : > { %p4575_p0 = pneg %p4574_p13  ;;  %p4581_p10 = por %p4580_p6, %p4579_p2 }
  0x7a   : > { %p4582_p5 = pnand %p4581_p10, %p4575_p0 }
  0x7c   : > { %4585 = shalt.err (!%p4582_p5)
}
  0x7d   : > { %s4586_s30 = scalar_lea.vmem %s5199_s20, 1024  ;;  %s4887_s16 = smov [#allocation12]  }
  0x7e   : > { %p4587_p4 = scmp.ne.s32.totalorder %s5199_s20, %s4586_s30  ;;  %s4591_s9 = sshll.u32 %s4887_s16, 4  ;;  %s4592_s9 = int_to_ptr.vmem [resolvable:$false] %s4591_s9 }
  0x7f   : > { %s4593_s15 = scalar_lea.vmem %s4592_s9, 2048  ;;  %p4594_p7 = scmp.lt.s32.totalorder %s5199_s20, %s4592_s9 }
  0x80   : > { %p4589_p9 = pnand %p4587_p4, %p5167_p12  ;;  %p4595_p13 = scmp.lt.s32.totalorder %s4593_s15, %s4586_s30 }
  0x82   : > { %p4590_p11 = pneg %p4589_p9  ;;  %p4596_p3 = por %p4595_p13, %p4594_p7 }
  0x84   : > { %p4597_p1 = pnand %p4596_p3, %p4590_p11 }
  0x86   : > { %4600 = shalt.err (!%p4597_p1)
}
  0x87   : > { %s6156_s11 = smov 4   ;;  %s6157_s17 = smov 64  }
  0x88   : > { %4227 = dma.hbm_to_vmem [thread:$0]  (!%p5156_p8), %s5195_s19, 1024, %s5199_s20, %s5103_s13, %s6157_s17, %s6157_s17, %s6156_s11  }
  0x89   : > { %s5227_s22 = sadd.s32 4294967295, %s4879_s1   ;;  %s3855_s6 = sadd.s32 4294967294, %s4879_s1  }
  0x8a   : > { %p67_p0 = scmp.ne.s32.totalorder %s4855_s28, %s4851_s27  ;;  %p6103_p2 = scmp.eq.s32.totalorder %s5227_s22, 0 }
  0x8b   : > { %p208_p6 = scmp.ne.s32.totalorder %s4843_s25, %s4839_s24  ;;  %p487_p10 = scmp.eq.s32.totalorder %s5227_s22, 3 }
  0x8c   : > { %p493_p5 = scmp.eq.s32.totalorder %s3855_s6, 3  ;;  %p5238_p4 = por %p6103_p2, %p67_p0 }
  0x8d   : > { %p5244_p9 = por %p208_p6, %p6103_p2  ;;  %p6162_p11 = scmp.ne.s32.totalorder %s4859_s29, %s4855_s28 }
  0x8e   : > { %s6158_s20 = scalar_select %p5238_p4, 1, 0 }
  0x8f   : > { %s6160_s19 = scalar_select %p5244_p9, 1, 0 }
  0x90   : > { %6159 = sst [smem:[#allocation34_spill]] %s6158_s20  ;;  %p5251_p7 = por %p487_p10, %p6162_p11 }
  0x91   : > { %6161 = sst [smem:[#allocation35_spill]] %s6160_s19  ;;  %p5255_p13 = por %p493_p5, %p67_p0 }
  0x92   : > { %s6163_s21 = scalar_select %p5251_p7, 1, 0 }
  0x93   : > { %s6165_s24 = scalar_select %p5255_p13, 1, 0 }
  0x94   : > { %6164 = sst [smem:[#allocation36_spill]] %s6163_s21  ;;  %p3856_p3 = scmp.ge.s32.totalorder %s4879_s1, 1 }
  0x95   : > { %6166 = sst [smem:[#allocation37_spill]] %s6165_s24  ;;  %p500_p1 = scmp.lt.s32.totalorder %s4879_s1, 5 }
  0x96   : > { %s4888_s30 = smov [#allocation6]   ;;  %s6110_s9 = sshll.u32 %s5146_s10, 7 }
  0x97   : > { %p5261_p8 = pnand %p3856_p3, %p500_p1  ;;  %s512_s16 = sshll.u32 %s4888_s30, 4  ;;  %s5265_s16 = int_to_ptr.vmem [resolvable:$true] %s512_s16 }
  0x98   : > { %s6111_s15 = sshll.u32 %s4871_s18, 11  ;;  %s6169_s12 = sld [smem:[#allocation50_spill]] }
  0x99   : > { %s6167_s5 = scalar_select %p5261_p8, 1, 0 }
  0x9a   : > { %p4208_p6 = pneg %p5261_p8  ;;  %s657_s30 = scalar_lea.vmem [#allocation13], %s6110_s9 }
  0x9b   : > { %s664_s26 = sshll.u32 %s657_s30, 4  ;;  %s6170_s1 = sld [smem:[#allocation39_spill]]  ;;  %s5286_s26 = int_to_ptr.vmem [resolvable:$true] %s664_s26 }
  0x9c   : > { %p5273_p0 = pnand %p4208_p6, %p6103_p2 }
  0x9e   : > { %s6168_s6 = scalar_select %p5273_p0, 1, 0 }
  0x9f   : > { %s5282_s23 = scalar_lea.hbm %s6169_s12, %s6111_s15  ;;  %p5296_p5 = pneg %p5273_p0 }
  0xa1   : > { %s6171_s21 = smov %s6170_s1  ;;  %s4601_s0 = scalar_lea.hbm %s6170_s1, 1024 }
  0xa2   : > { %p4602_p10 = scmp.ne.s32.totalorder %s6171_s21, %s4601_s0  ;;  %p4608_p1 = scmp.lt.u32.totalorder %s4601_s0, %s6171_s21 }
  0xa4   : > { %p4604_p11 = pnand %p5296_p5, %p4602_p10 }
  0xa6   : > { %p4605_p3 = pneg %p4604_p11 }
  0xa8   : > { %p4610_p6 = pnand %p4608_p1, %p4605_p3 }
  0xaa   : > { %4613 = shalt.err (!%p4610_p6)
}
  0xab   : > { %s4614_s25 = scalar_lea.vmem %s5265_s16, 1024  ;;  %p4622_p9 = scmp.lt.s32.totalorder %s5265_s16, %s5265_s16 }
  0xac   : > { %p4615_p2 = scmp.ne.s32.totalorder %s5265_s16, %s4614_s25  ;;  %p4623_p4 = scmp.lt.s32.totalorder %s4614_s25, %s4614_s25 }
  0xae   : > { %p4617_p13 = pnand %p4615_p2, %p5296_p5  ;;  %p4624_p10 = por %p4623_p4, %p4622_p9 }
  0xb0   : > { %p4618_p7 = pneg %p4617_p13 }
  0xb2   : > { %p4625_p11 = pnand %p4624_p10, %p4618_p7 }
  0xb4   : > { %4628 = shalt.err (!%p4625_p11)
}
  0xb5   : > { %4211 = dma.hbm_to_vmem [thread:$0]  (!%p5273_p0), %s6171_s21, 1024, %s5265_s16, [#allocation7], %s6157_s17, %s6157_s17, %s6156_s11  }
  0xb6   : > { %s4629_s1 = scalar_lea.hbm %s5282_s23, 2048  ;;  %s4634_s30 = scalar_lea.hbm %s6169_s12, 4096 }
  0xb7   : > { %p4630_p2 = scmp.ne.s32.totalorder %s5282_s23, %s4629_s1  ;;  %p4635_p7 = scmp.lt.u32.totalorder %s5282_s23, %s6169_s12 }
  0xb8   : > { %p4636_p13 = scmp.lt.u32.totalorder %s4634_s30, %s4629_s1  ;;  %p4638_p1 = scmp.lt.u32.totalorder %s4629_s1, %s5282_s23 }
  0xb9   : > { %p4632_p4 = pnand %p4630_p2, %p5167_p12 }
  0xba   : > { %p4637_p3 = por %p4636_p13, %p4635_p7 }
  0xbb   : > { %p4633_p9 = pneg %p4632_p4 }
  0xbc   : > { %p4639_p6 = por %p4638_p1, %p4637_p3 }
  0xbe   : > { %p4640_p10 = pnand %p4639_p6, %p4633_p9 }
  0xc0   : > { %4643 = shalt.err (!%p4640_p10)
}
  0xc1   : > { %s4644_s16 = scalar_lea.vmem %s5286_s26, 2048  ;;  %s4889_s25 = smov [#allocation13]  }
  0xc2   : > { %p4645_p11 = scmp.ne.s32.totalorder %s5286_s26, %s4644_s16  ;;  %s4649_s27 = sshll.u32 %s4889_s25, 4  ;;  %s4650_s27 = int_to_ptr.vmem [resolvable:$false] %s4649_s27 }
  0xc3   : > { %s4651_s0 = scalar_lea.vmem %s4650_s27, 4096  ;;  %p4652_p8 = scmp.lt.s32.totalorder %s5286_s26, %s4650_s27 }
  0xc4   : > { %p4647_p2 = pnand %p4645_p11, %p5167_p12  ;;  %p4653_p0 = scmp.lt.s32.totalorder %s4651_s0, %s4644_s16 }
  0xc6   : > { %p4648_p4 = pneg %p4647_p2  ;;  %p4654_p7 = por %p4653_p0, %p4652_p8 }
  0xc8   : > { %p4655_p13 = pnand %p4654_p7, %p4648_p4 }
  0xca   : > { %4658 = shalt.err (!%p4655_p13)
}
  0xcb   : > { %s4890_s1 = smov 128   ;;  %s4891_s19 = smov 8  }
  0xcc   : > { %p6173_p9 = scmp.ne.s32.totalorder %s6152_s4, 0  ;;  %s4892_s24 = smov [#allocation8]  }
  0xcd   : > { %s526_s30 = sshll.u32 %s4892_s24, 4  ;;  %s4893_s8 = smov [#allocation9]   ;;  %s527_s30 = int_to_ptr.vmem [resolvable:$true] %s526_s30 }
  0xce   : > { %4230 = dma.hbm_to_vmem [thread:$0]  (!%p6173_p9), %s5282_s23, 2048, %s5286_s26, %s5103_s13, %s4890_s1, %s4890_s1, %s4891_s19  }
  0xcf   : > { %s536_s29 = sshll.u32 %s4893_s8, 4  ;;  %s6174_s2 = sld [smem:[#allocation40_spill]]  ;;  %s5345_s29 = int_to_ptr.vmem [resolvable:$true] %s536_s29 }
  0xd5   : > { %s4659_s27 = scalar_lea.hbm %s6174_s2, 16 }
  0xd6   : > { %p4660_p8 = scmp.ne.s32.totalorder %s6174_s2, %s4659_s27  ;;  %p4666_p1 = scmp.lt.u32.totalorder %s4659_s27, %s6174_s2 }
  0xd8   : > { %p4662_p0 = pnand %p4660_p8, %p5296_p5 }
  0xda   : > { %p4663_p3 = pneg %p4662_p0 }
  0xdc   : > { %p4668_p6 = pnand %p4666_p1, %p4663_p3 }
  0xde   : > { %4671 = shalt.err (!%p4668_p6)
}
  0xdf   : > { %s4672_s23 = scalar_lea.vmem %s527_s30, 16  ;;  %s4679_s24 = scalar_lea.vmem %s527_s30, 32 }
  0xe0   : > { %p4673_p10 = scmp.ne.s32.totalorder %s527_s30, %s4672_s23  ;;  %p4680_p4 = scmp.lt.s32.totalorder %s527_s30, %s527_s30 }
  0xe1   : > { %p4681_p7 = scmp.lt.s32.totalorder %s4679_s24, %s4672_s23 }
  0xe2   : > { %p4675_p11 = pnand %p4673_p10, %p5296_p5 }
  0xe3   : > { %p4682_p13 = por %p4681_p7, %p4680_p4 }
  0xe4   : > { %p4676_p2 = pneg %p4675_p11 }
  0xe6   : > { %p4683_p9 = pnand %p4682_p13, %p4676_p2 }
  0xe8   : > { %4686 = shalt.err (!%p4683_p9)
}
  0xe9   : > { %p6175_p8 = scmp.ne.s32.totalorder %s6168_s6, 0  ;;  %s6176_s3 = sld [smem:[#allocation41_spill]] }
  0xeb   : > { %4214 = dma.hbm_to_vmem [thread:$0]  (!%p6175_p8), %s6174_s2, 16, %s527_s30, [#allocation7]  }
  0xef   : > { %s4687_s25 = scalar_lea.hbm %s6176_s3, 256 }
  0xf0   : > { %p4688_p0 = scmp.ne.s32.totalorder %s6176_s3, %s4687_s25  ;;  %p4694_p9 = scmp.lt.u32.totalorder %s4687_s25, %s6176_s3 }
  0xf2   : > { %p4690_p3 = pnand %p4688_p0, %p5296_p5 }
  0xf4   : > { %p4691_p1 = pneg %p4690_p3 }
  0xf6   : > { %p4696_p6 = pnand %p4694_p9, %p4691_p1 }
  0xf8   : > { %4699 = shalt.err (!%p4696_p6)
}
  0xf9   : > { %s4700_s30 = scalar_lea.vmem %s5345_s29, 256  ;;  %p4708_p4 = scmp.lt.s32.totalorder %s5345_s29, %s5345_s29 }
  0xfa   : > { %p4701_p10 = scmp.ne.s32.totalorder %s5345_s29, %s4700_s30  ;;  %p4709_p7 = scmp.lt.s32.totalorder %s4700_s30, %s4700_s30 }
  0xfc   : > { %p4703_p11 = pnand %p4701_p10, %p5296_p5  ;;  %p4710_p13 = por %p4709_p7, %p4708_p4 }
  0xfe   : > { %p4704_p2 = pneg %p4703_p11 }
 0x100   : > { %p4711_p0 = pnand %p4710_p13, %p4704_p2 }
 0x102   : > { %4714 = shalt.err (!%p4711_p0)
}
 0x103   : > { %4217 = dma.hbm_to_vmem [thread:$0]  (!%p6175_p8), %s6176_s3, 256, %s5345_s29, [#allocation10], %s4890_s1, %s4890_s1, %s4891_s19  }
 0x104   : > { %s6177_s20 = sshll.u32 %s4871_s18, 11  ;;  %s6178_s14 = sld [smem:[#allocation52_spill]] }
 0x105   : > { %s6179_s25 = sshll.u32 %s5146_s10, 7 }
 0x106   : > { %s685_s6 = scalar_lea.vmem [#allocation14], %s6179_s25 }
 0x107   : > { %s692_s27 = sshll.u32 %s685_s6, 4  ;;  %s5400_s27 = int_to_ptr.vmem [resolvable:$true] %s692_s27 }
 0x10a   : > { %s5396_s16 = scalar_lea.hbm %s6178_s14, %s6177_s20  ;;  %s4720_s29 = scalar_lea.hbm %s6178_s14, 4096 }
 0x10b   : > { %s4715_s0 = scalar_lea.hbm %s5396_s16, 2048  ;;  %p4721_p1 = scmp.lt.u32.totalorder %s5396_s16, %s6178_s14 }
 0x10c   : > { %p4716_p5 = scmp.ne.s32.totalorder %s5396_s16, %s4715_s0  ;;  %p4722_p9 = scmp.lt.u32.totalorder %s4720_s29, %s4715_s0 }
 0x10d   : > { %p4724_p10 = scmp.lt.u32.totalorder %s4715_s0, %s5396_s16 }
 0x10e   : > { %p4718_p3 = pnand %p4716_p5, %p5167_p12  ;;  %p4723_p6 = por %p4722_p9, %p4721_p1 }
 0x110   : > { %p4719_p8 = pneg %p4718_p3  ;;  %p4725_p11 = por %p4724_p10, %p4723_p6 }
 0x112   : > { %p4726_p2 = pnand %p4725_p11, %p4719_p8 }
 0x114   : > { %4729 = shalt.err (!%p4726_p2)
}
 0x115   : > { %s4730_s10 = scalar_lea.vmem %s5400_s27, 2048  ;;  %s4894_s30 = smov [#allocation14]  }
 0x116   : > { %p4731_p4 = scmp.ne.s32.totalorder %s5400_s27, %s4730_s10  ;;  %s4735_s24 = sshll.u32 %s4894_s30, 4  ;;  %s4736_s24 = int_to_ptr.vmem [resolvable:$false] %s4735_s24 }
 0x117   : > { %s4737_s9 = scalar_lea.vmem %s4736_s24, 4096  ;;  %p4738_p0 = scmp.lt.s32.totalorder %s5400_s27, %s4736_s24 }
 0x118   : > { %p4733_p7 = pnand %p4731_p4, %p5167_p12  ;;  %p4739_p5 = scmp.lt.s32.totalorder %s4737_s9, %s4730_s10 }
 0x11a   : > { %p4734_p13 = pneg %p4733_p7  ;;  %p4740_p3 = por %p4739_p5, %p4738_p0 }
 0x11c   : > { %p4741_p1 = pnand %p4740_p3, %p4734_p13 }
 0x11e   : > { %4744 = shalt.err (!%p4741_p1)
}
 0x11f   : > { %p6180_p8 = scmp.ne.s32.totalorder %s6152_s4, 0  ;;  %p6181_p12 = scmp.ne.s32.totalorder %s6167_s5, 0 }
 0x120   : > { %s6182_s7 = sld [smem:[#allocation34_spill]] (!%p6181_p12)  ;;  %s712_s20 = sand.u32 (!%p6181_p12), 1, %s5227_s22  }
 0x121   : > { %4233 = dma.hbm_to_vmem [thread:$0]  (!%p6180_p8), %s5396_s16, 2048, %s5400_s27, %s5103_s13, %s6157_s17, %s6157_s17, %s6156_s11  }
 0x122   : > { %710 = sbr.rel (%p6181_p12) target bundleno = 3358 (0xd1e), region = 88  ;;  %s5431_s8 = sand.u32 (!%p6181_p12), 1, %s4855_s28  }
 0x123   : > { %s3875_s15 = sshll.u32 (!%p6181_p12), %s5431_s8, 3  ;;  %s713_s25 = scalar_lea.sflag (!%p6181_p12), [#allocation4], %s712_s20 }
 0x124   : > { %s5434_s4 = scalar_lea.vmem (!%p6181_p12), [#allocation3], %s3875_s15 }
 0x126   : > { %p6183_p9 = scmp.ne.s32.totalorder (!%p6181_p12), %s6182_s7, 0 }
 0x129   : > { %4818 = dma.done.wait (%p6183_p9), %s713_s25, 128  }
 0x12a   : > { %4820 = vsyncadd (%p6183_p9), %s713_s25, 4294967168  ;;  %p6184_p6 = scmp.eq.s32.totalorder %s5227_s22, 0 }
 0x12c   : > { %4822 = dma.done.wait (%p6184_p6), [#allocation7], 1040   ;;  %p6185_p10 = pmov %p6184_p6 }
 0x12d   : > { %p6186_p11 = pmov %p6184_p6 }
 0x12e   : > { %4824 = vsyncadd (%p6185_p10), [#allocation7], 4294966256 }
 0x12f   : > { %4826 = dma.done.wait (%p6186_p11), [#allocation10], 256   ;;  %p6187_p2 = pmov %p6184_p6 }
 0x130   : > { %s6188_s13 = sld [smem:[#allocation21_spill]]  ;;  %s6189_s11 = sld [smem:[#allocation35_spill]] }
 0x131   : > { %4828 = vsyncadd (%p6187_p2), [#allocation10], 4294967040 }
 0x136   : > { %s735_s17 = sand.u32 1, %s6188_s13   ;;  %p6190_p4 = scmp.ne.s32.totalorder %s6189_s11, 0 }
 0x137   : > { %s4182_s5 = smul.u32 192, %s735_s17 }
 0x139   : > { %s5449_s16 = scalar_lea.vmem [#allocation11], %s4182_s5 }
 0x13a   : > { %4830 = dma.done.wait (%p6190_p4), %s713_s25, 8192  }
 0x13b   : > { %4832 = vsyncadd (%p6190_p4), %s713_s25, 4294959104  ;;  %s6191_s6 = sld [smem:[#allocation25_spill]]  ;;  %s3879_s27 = sshll.u32 %s735_s17, 6 }
 0x13c   : > { %s3880_s0 = sshll.u32 %s735_s17, 7  ;;  %s3882_s1 = sshll.u32 %s5431_s8, 2 }
 0x13d   : > { %s6194_s25 = sld [smem:[#allocation47_spill]]  ;;  %s6195_s5 = sld [smem:[#allocation48_spill]] }
 0x13e   : > { %s6196_s3 = sld [smem:[#allocation49_spill]]  ;;  %s6197_s26 = sld [smem:[#allocation45_spill]] }
 0x13f   : > { %s6198_s9 = sld [smem:[#allocation51_spill]]  ;;  %s5496_s17 = scalar_lea.vmem [#allocation12], %s3879_s27 }
 0x140   : > { %s5500_s2 = scalar_lea.vmem [#allocation14], %s3880_s0 }
 0x141   : > { %p861_p7 = scmp.lt.s32.totalorder %s6191_s6, 1  ;;  %p3884_p13 = scmp.ne.s32.totalorder %s6191_s6, 0 }
 0x142   : > { %v4355_v0 = vld [vmem:[#allocation6] sm:$0xff] (!%p3884_p13)   ;;  %v4895_v1 = vmov (!%p3884_p13), 0.0   ;;  %v4356_v2 = vld [vmem:[#allocation6 + $0x8] sm:$0xff] (!%p3884_p13)   ;;  %vm4896_vm0 = vmmov (!%p3884_p13), 0   ;;  %v4357_v3 = vld [vmem:[#allocation6 + $0x10] sm:$0xff] (!%p3884_p13)  }
 0x143   : > { %s5458_s22 = scalar_select %p861_p7, %s6191_s6, 1 }
 0x144   : > { %4066 = vmatprep.subr.bf16.mxu0 (!%p3884_p13), %v4895_v1  ;;  %4082 = vmatprep.mubr.msk.bf16.mxu0 (!%p3884_p13), %vm4896_vm0, %v4895_v1  ;;  %v4358_v4 = vld [vmem:[#allocation6 + $0x18] sm:$0xff] (!%p3884_p13)   ;;  %v4359_v5 = vld [vmem:[#allocation6 + $0x20] sm:$0xff] (!%p3884_p13)   ;;  %v4360_v6 = vld [vmem:[#allocation6 + $0x28] sm:$0xff] (!%p3884_p13)  }
 0x145   : > { %s4183_s7 = smul.u32 3, %s5458_s22  ;;  %s873_s13 = scalar_lea.vmem %s6194_s25, %s5458_s22  ;;  %4067 = vmatpush3.bf16.msra.mxu0 (!%p3884_p13), %v4355_v0  ;;  %v4361_v7 = vld [vmem:[#allocation6 + $0x30] sm:$0xff] (!%p3884_p13)   ;;  %v4362_v8 = vld [vmem:[#allocation6 + $0x38] sm:$0xff] (!%p3884_p13)   ;;  %v3885_v10 = vld [vmem:[#allocation8] ss:$0 sm:$0xff] (!%p3884_p13) }
 0x146   : > { %s876_s19 = scalar_lea.vmem %s6195_s5, %s5458_s22  ;;  %s879_s12 = scalar_lea.vmem %s6196_s3, %s5458_s22  ;;  %4068 = vmatprep.subr.bf16.mxu0 (!%p3884_p13), %v4895_v1  ;;  %v4363_v9 = vld [vmem:[%s5434_s4] sm:$0xff] (!%p3884_p13)   ;;  %v1012_v12 = vld [vmem:[#allocation9] sm:$0xff] (!%p3884_p13) }
 0x147   : > { %s5484_s23 = scalar_lea.vmem %s6197_s26, %s4183_s7  ;;  %s3883_s10 = sshll.u32 %s5458_s22, 1  ;;  %v1013_v16 = vld [vmem:[#allocation9 + $0x8] sm:$0xff] (!%p3884_p13) }
 0x148   : > { %s5490_s18 = scalar_lea.vmem %s6198_s9, %s3883_s10  ;;  %s6199_s25 = sld [smem:[#allocation53_spill]] }
 0x149   : > { %s5498_s5 = scalar_lea.vmem [#allocation13], %s3880_s0  ;;  %s5502_s3 = scalar_lea.vmem [#allocation15], %s3882_s1  ;;  %4069 = vmatpush3.bf16.msra.mxu0 (!%p3884_p13), %v4356_v2 }
 0x14a   : > { %891 = sbr.rel (%p3884_p13) target bundleno = 575 (0x23f), region = 124  ;;  %4070 = vmatprep.subr.bf16.mxu0 (!%p3884_p13), %v4895_v1 }
 0x14d   : > { %4071 = vmatpush3.bf16.msra.mxu0 (!%p3884_p13), %v4357_v3 }
 0x14e   : > { %s886_s11 = scalar_lea.vmem %s6199_s25, %s5458_s22  ;;  %4072 = vmatprep.subr.bf16.mxu0 (!%p3884_p13), %v4895_v1 }
 0x151   : > { %4073 = vmatpush3.bf16.msra.mxu0 %v4358_v4 }
 0x152   : > { %4074 = vmatprep.subr.bf16.mxu0 %v4895_v1 }
 0x155   : > { %4075 = vmatpush3.bf16.msra.mxu0 %v4359_v5 }
 0x156   : > { %4076 = vmatprep.subr.bf16.mxu0 %v4895_v1 }
 0x159   : > { %4077 = vmatpush3.bf16.msra.mxu0 %v4360_v6 }
 0x15a   : > { %4078 = vmatprep.subr.bf16.mxu0 %v4895_v1 }
 0x15d   : > { %4079 = vmatpush3.bf16.msra.mxu0 %v4361_v7 }
 0x15e   : > { %4080 = vmatprep.subr.bf16.mxu0 %v4895_v1 }
 0x161   : > { %4081 = vmatpush3.bf16.msra.mxu0 %v4362_v8 }
 0x164   : > { %4083 = vmatmul.mubr.bf16.vlgmr.msra.gmra.mrb[0].mxu0 %v4363_v9 }
 0x237   : > { %v1005_v11 = vpop.f32.mrb[0].mxu0 }
 0x238   : > { %v1006_v13 = vadd.f32 %v3885_v10, %v1005_v11  ;;  %v4084_v14 = vpop.f32.mrb[1].mxu0 }
 0x239   : > { %v1008_v15 = vpop.f32.mrb[2].mxu0 }
 0x23a   : > { %v1014_v17 = vadd.f32 %v1012_v12, %v1006_v13  ;;  %v1009_v18 = vadd.f32 %v3885_v10, %v1008_v15  ;;  %v4085_v19 = vpop.f32.mrb[3].mxu0 }
 0x23c   : > { %1016 = vst [vmem:[#allocation2] sm:$0xff] %v1014_v17  ;;  %v1015_v20 = vadd.f32 %v1013_v16, %v1009_v18 }
 0x23e   : > { %1017 = vst [vmem:[#allocation2 + $0x8] sm:$0xff] %v1015_v20 }
 0x23f PF: > { %v4379_v24 = vld [vmem:[%s5449_s16 + $0x4] ss:$12 sps:$4 sm:$0xff]   ;;  %v4897_v25 = vmov 0.0   ;;  %v4381_v27 = vld [vmem:[%s5449_s16] ss:$12 sps:$4 sm:$0xff]   ;;  %v4898_v47 = vmov 0   ;;  %v1100_v14 = vlaneseq }
 0x240   : > { %4086 = vmatprep.subr.bf16.mxu1 %v4897_v25  ;;  %1243 = vmatprep.subr.bf16.mxu0 %v4379_v24  ;;  %v4382_v28 = vld [vmem:[%s5449_s16 + $0x8] ss:$12 sps:$4 sm:$0xff]   ;;  %v4385_v30 = vld [vmem:[%s5449_s16 + $0x18] ss:$12 sps:$4 sm:$0xff]   ;;  %v4386_v31 = vld [vmem:[%s5449_s16 + $0x20] ss:$12 sps:$4 sm:$0xff]  }
 0x241   : > { %1244 = vmatpush1.bf16.msra.mxu0 %v4381_v27  ;;  %4087 = vmatpush3.bf16.msra.mxu1 %v4382_v28  ;;  %v4383_v29 = vld [vmem:[%s5449_s16 + $0x1c] ss:$12 sps:$4 sm:$0xff]   ;;  %v4387_v32 = vld [vmem:[%s5449_s16 + $0x34] ss:$12 sps:$4 sm:$0xff]   ;;  %v4390_v34 = vld [vmem:[%s5449_s16 + $0x38] ss:$12 sps:$4 sm:$0xff]  }
 0x242   : > { %4088 = vmatprep.subr.bf16.mxu1 %v4897_v25  ;;  %1245 = vmatprep.subr.bf16.mxu0 %v4383_v29  ;;  %v4389_v33 = vld [vmem:[%s5449_s16 + $0x30] ss:$12 sps:$4 sm:$0xff]   ;;  %v4391_v35 = vld [vmem:[%s5449_s16 + $0x4c] ss:$12 sps:$4 sm:$0xff]   ;;  %v4393_v36 = vld [vmem:[%s5449_s16 + $0x48] ss:$12 sps:$4 sm:$0xff]  }
 0x243   : > { %v5506_v21 = vld [vmem:[#allocation2] sm:$0xff]  ;;  %v4399_v41 = vld [vmem:[%s5449_s16 + $0x7c] ss:$12 sps:$4 sm:$0xff]   ;;  %v4401_v42 = vld [vmem:[%s5449_s16 + $0x78] ss:$12 sps:$4 sm:$0xff]   ;;  %1275 = vmatprep.mubr.bf16.mxu0 %v4898_v47  ;;  %vm4899_vm1 = vmmov 0  }
 0x244   : > { %1020 = vadd.xlane.f32.xlu0 %v5506_v21  ;;  %v1027_v23 = vmul.f32 %v5506_v21, %v5506_v21  ;;  %v4394_v37 = vld [vmem:[%s5449_s16 + $0x50] ss:$12 sps:$4 sm:$0xff]   ;;  %v4397_v39 = vld [vmem:[%s5449_s16 + $0x60] ss:$12 sps:$4 sm:$0xff]   ;;  %v4398_v40 = vld [vmem:[%s5449_s16 + $0x68] ss:$12 sps:$4 sm:$0xff]   ;;  %4102 = vmatprep.mubr.msk.bf16.mxu1 %vm4899_vm1, %v4897_v25 }
 0x245   : > { %v5508_v22 = vld [vmem:[#allocation2 + $0x8] sm:$0xff]  ;;  %1246 = vmatpush1.bf16.msra.mxu0 %v4385_v30  ;;  %4089 = vmatpush3.bf16.msra.mxu1 %v4386_v31  ;;  %v4395_v38 = vld [vmem:[%s5449_s16 + $0x64] ss:$12 sps:$4 sm:$0xff]   ;;  %v4402_v43 = vld [vmem:[%s5449_s16 + $0x80] ss:$12 sps:$4 sm:$0xff]   ;;  %s6200_s4 = sld [smem:[#allocation42_spill]] }
 0x246   : > { %1029 = vadd.xlane.f32.xlu1 %v1027_v23  ;;  %v1028_v26 = vmul.f32 %v5508_v22, %v5508_v22  ;;  %4090 = vmatprep.subr.bf16.mxu1 %v4897_v25  ;;  %v4403_v44 = vld [vmem:[%s5449_s16 + $0x94] ss:$12 sps:$4 sm:$0xff]   ;;  %v4405_v45 = vld [vmem:[%s5449_s16 + $0x90] ss:$12 sps:$4 sm:$0xff]   ;;  %v4406_v46 = vld [vmem:[%s5449_s16 + $0x98] ss:$12 sps:$4 sm:$0xff]  }
 0x247   : > { %1247 = vmatprep.subr.bf16.mxu0 %v4387_v32  ;;  %v4407_v48 = vld [vmem:[%s5449_s16 + $0xac] ss:$12 sps:$4 sm:$0xff]   ;;  %v4409_v49 = vld [vmem:[%s5449_s16 + $0xa8] ss:$12 sps:$4 sm:$0xff]   ;;  %v4410_v50 = vld [vmem:[%s5449_s16 + $0xb0] ss:$12 sps:$4 sm:$0xff]  }
 0x248   : > { %1022 = vadd.xlane.f32.xlu0 %v5508_v22  ;;  %s6202_s0 = sld [smem:[#allocation43_spill]]  ;;  %v5569_v15 = vshrl.u32 %v1100_v14, 7  ;;  %v5573_v17 = vld [vmem:[%s5484_s23] sm:$0x7]  ;;  %s4900_s23 = smov 96   ;;  %vm2215_vm2 = vcmask 261120  }
 0x249   : > { %1248 = vmatpush1.bf16.msra.mxu0 %v4389_v33  ;;  %4091 = vmatpush3.bf16.msra.mxu1 %v4390_v34  ;;  %s4901_s9 = smov 64   ;;  %s4902_s7 = smov 32   ;;  %v4903_v34 = vmov 1983009808   ;;  %vm2412_vm3 = vcmask 130048   ;;  %vm2979_vm4 = vcmask 523264  }
 0x24a   : > { %1031 = vadd.xlane.f32.xlu1 %v1028_v26  ;;  %4092 = vmatprep.subr.bf16.mxu1 %v4897_v25  ;;  %v1102_v16 = vsub.s32 0, %v5569_v15  ;;  %v1106_v18 = vsub.s32 1, %v5569_v15  ;;  %vm2982_vm5 = vcmask 785408  }
 0x24b   : > { %1249 = vmatprep.subr.bf16.mxu0 %v4391_v35  ;;  %s6201_s16 = scalar_lea.vmem %s6200_s4, %s5458_s22  ;;  %v1350_v35 = vunpack.c.l.s4 %v4903_v34 }
 0x24c   : > { %v3895_v1 = vld [vmem:[%s6201_s16] ss:$0 sm:$0xff]  ;;  %v1103_v19 = vrot.slane %v5573_v17, %v1102_v16  ;;  %v1107_v20 = vrot.slane %v5573_v17, %v1106_v18 }
 0x24d   : > { %1250 = vmatpush1.bf16.msra.mxu0 %v4393_v36  ;;  %4093 = vmatpush3.bf16.msra.mxu1 %v4394_v37 }
 0x24e   : > { %4094 = vmatprep.subr.bf16.mxu1 %v4897_v25  ;;  %1251 = vmatprep.subr.bf16.mxu0 %v4395_v38  ;;  %s6203_s1 = scalar_lea.vmem %s6202_s0, %s5458_s22  ;;  %v4904_v38 = vmov 1934713408  }
 0x24f   : > { %v3896_v9 = vld [vmem:[%s6203_s1] ss:$0 sm:$0xff] }
 0x251   : > { %1252 = vmatpush1.bf16.msra.mxu0 %v4397_v39  ;;  %4095 = vmatpush3.bf16.msra.mxu1 %v4398_v40  ;;  %v1382_v39 = vunpack.c.l.s4 %v4904_v38  ;;  %v1351_v40 = vunpack.c.0.s8 %v1350_v35 }
 0x252   : > { %1253 = vmatprep.subr.bf16.mxu0 %v4399_v41  ;;  %4096 = vmatprep.subr.bf16.mxu1 %v4897_v25 }
 0x255   : > { %1254 = vmatpush1.bf16.msra.mxu0 %v4401_v42  ;;  %4097 = vmatpush3.bf16.msra.mxu1 %v4402_v43  ;;  %v1383_v43 = vunpack.c.0.s8 %v1382_v39 }
 0x256   : > { %1255 = vmatprep.subr.bf16.mxu0 %v4403_v44  ;;  %4098 = vmatprep.subr.bf16.mxu1 %v4897_v25  ;;  %v5611_v44 = vsub.s32 %v1351_v40, %v5569_v15 }
 0x259   : > { %1256 = vmatpush1.bf16.msra.mxu0 %v4405_v45  ;;  %4099 = vmatpush3.bf16.msra.mxu1 %v4406_v46 }
 0x25a   : > { %1257 = vmatprep.subr.bf16.mxu0 %v4407_v48  ;;  %4100 = vmatprep.subr.bf16.mxu1 %v4897_v25 }
 0x25d   : > { %1258 = vmatpush1.bf16.msra.mxu0 %v4409_v49  ;;  %4101 = vmatpush3.bf16.msra.mxu1 %v4410_v50 }
 0x25e   : > { %4106 = vmatprep.subr.bf16.mxu1 %v4897_v25  ;;  %4130 = vmatprep.subr.bf16.mxu0 %v4897_v25 }
 0x2d1   : > { %v1021_v51 = vpop.xlane.xlu0 %1020 }
 0x2d2   : > { %v1025_v52 = vmul.f32 0.0078125, %v1021_v51 }
 0x2d3   : > { %v1030_v53 = vpop.xlane.xlu1 %1029 }
 0x2d4   : > { %v1035_v54 = vmul.f32 %v1025_v52, %v1025_v52  ;;  %v1033_v55 = vmul.f32 0.0078125, %v1030_v53  ;;  %v1039_v4 = vsub.f32 %v5506_v21, %v1025_v52  ;;  %v5614_v52 = vsub.s32 %v1383_v43, %v5569_v15 }
 0x2d5   : > { %v1023_v56 = vpop.xlane.xlu0 %1022 }
 0x2d6   : > { %v1037_v57 = vsub.f32 %v1033_v55, %v1035_v54  ;;  %v1026_v58 = vmul.f32 0.0078125, %v1023_v56 }
 0x2d7   : > { %v1032_v59 = vpop.xlane.xlu1 %1031 }
 0x2d8   : > { %v1041_v60 = vadd.f32 1e-06, %v1037_v57  ;;  %v1036_v61 = vmul.f32 %v1026_v58, %v1026_v58  ;;  %v1034_v62 = vmul.f32 0.0078125, %v1032_v59  ;;  %v1040_v6 = vsub.f32 %v5508_v22, %v1026_v58 }
 0x2da   : > { %4459 = vrsqrt.f32 %v1041_v60  ;;  %v1038_v63 = vsub.f32 %v1034_v62, %v1036_v61 }
 0x2dc   : > { %v1042_v0 = vadd.f32 1e-06, %v1038_v63 }
 0x2de   : > { %4461 = vrsqrt.f32 %v1042_v0 }
 0x2e4   : > { %v4460_v2 = vpop.eup %4459 }
 0x2e5   : > { %v1052_v3 = vmul.f32 %v4460_v2, %v3895_v1 }
 0x2e7   : > { %v1054_v8 = vmul.f32 %v1052_v3, %v1039_v4 }
 0x2e8   : > { %v4462_v5 = vpop.eup %4461 }
 0x2e9   : > { %v1053_v7 = vmul.f32 %v4462_v5, %v3895_v1  ;;  %v1063_v11 = vadd.f32 %v3896_v9, %v1054_v8 }
 0x2eb   : > { %v1055_v10 = vmul.f32 %v1053_v7, %v1040_v6 }
 0x2ed   : > { %v1064_v12 = vadd.f32 %v3896_v9, %v1055_v10 }
 0x2ef   : > { %v1065_v13 = vpack.c.bf16 %v1064_v12, %v1063_v11 }
 0x2f1   : > { %1276 = vmatmul.mubr.bf16.vlgmr.msra.gmra.mrb[0].mxu0 %v1065_v13  ;;  %4103 = vmatmul.mubr.bf16.vlgmr.msra.gmra.mrb[0].mxu1 %v1065_v13 }
 0x2f2   : > { %4108 = vmatprep.mubr.msk.bf16.mxu1 %vm4899_vm1, %v4897_v25  ;;  %4132 = vmatprep.mubr.msk.bf16.mxu0 %vm4899_vm1, %v4897_v25 }
 0x3c4   : > { %v1277_v21 = vpop.f32.mrb[0].mxu0  ;;  %v5582_v22 = vpop.f32.mrb[0].mxu1 }
 0x3c5   : > { %v5584_v23 = vadd.f32 %v1277_v21, %v1103_v19  ;;  %v1279_v24 = vpop.f32.mrb[1].mxu0  ;;  %v4104_v26 = vpop.f32.mrb[1].mxu1 }
 0x3c6   : > { %v1280_v27 = vadd.f32 %v1279_v24, %v1107_v20  ;;  %v1281_v28 = vpop.f32.mrb[2].mxu0  ;;  %v5586_v29 = vpop.f32.mrb[2].mxu1 }
 0x3c7   : > { %v1283_v30 = vpop.f32.mrb[3].mxu0  ;;  %v4105_v31 = vpop.f32.mrb[3].mxu1  ;;  %1329 = vrot.lane.b32.xlu0 %v5584_v23, %s4900_s23  ;;  %v5591_v32 = vadd.f32 %v1281_v28, %v1103_v19 }
 0x3c8   : > { %1631 = vrot.lane.b32.xlu1 %v1280_v27, %s4901_s9  ;;  %v1284_v33 = vadd.f32 %v1283_v30, %v1107_v20 }
 0x3cb   : > { %1625 = vrot.lane.b32.xlu0 %v1280_v27, %s4900_s23 }
 0x3cc   : > { %1331 = vrot.lane.b32.xlu1 %v5591_v32, %s4900_s23 }
 0x3cf   : > { %1637 = vrot.lane.b32.xlu0 %v1280_v27, %s4902_s7 }
 0x3d0   : > { %1627 = vrot.lane.b32.xlu1 %v1284_v33, %s4900_s23 }
 0x3d3   : > { %1335 = vrot.lane.b32.xlu0 %v5584_v23, %s4901_s9 }
 0x3d4   : > { %1633 = vrot.lane.b32.xlu1 %v1284_v33, %s4901_s9 }
 0x3d7   : > { %1341 = vrot.lane.b32.xlu0 %v5584_v23, %s4902_s7 }
 0x3d8   : > { %1639 = vrot.lane.b32.xlu1 %v1284_v33, %s4902_s7 }
 0x3dc   : > { %1337 = vrot.lane.b32.xlu1 %v5591_v32, %s4901_s9 }
 0x3e0   : > { %1343 = vrot.lane.b32.xlu1 %v5591_v32, %s4902_s7 }
 0x439   : > { %v1330_v36 = vpop.permute.xlu0 %1329 }
 0x43a   : > { %v1632_v37 = vpop.permute.xlu1 %1631 }
 0x43b   : > { %v1643_v45 = vcombine.low %v1280_v27, %v1632_v37  ;;  %v1644_v46 = vcombine.high %v1280_v27, %v1632_v37 }
 0x43d   : > { %v1626_v41 = vpop.permute.xlu0 %1625  ;;  %v1651_v53 = vrot.slane %v1643_v45, %v5611_v44  ;;  %v1658_v54 = vrot.slane %v1644_v46, %v5611_v44 }
 0x43e   : > { %v5608_v42 = vpop.permute.xlu1 %1331 }
 0x441   : > { %v1638_v48 = vpop.permute.xlu0 %1637 }
 0x442   : > { %v1659_v49 = vcombine.low %v1626_v41, %v1638_v48  ;;  %v1660_v50 = vcombine.high %v1626_v41, %v1638_v48  ;;  %v1628_v51 = vpop.permute.xlu1 %1627 }
 0x444   : > { %v1667_v55 = vrot.slane %v1659_v49, %v5611_v44  ;;  %v1674_v56 = vrot.slane %v1660_v50, %v5611_v44 }
 0x445   : > { %v1336_v57 = vpop.permute.xlu0 %1335 }
 0x446   : > { %v1675_v58 = vcombine.low %v1651_v53, %v1667_v55  ;;  %v1676_v59 = vcombine.high %v1651_v53, %v1667_v55  ;;  %v1691_v60 = vcombine.low %v1658_v54, %v1674_v56  ;;  %v1692_v61 = vcombine.high %v1658_v54, %v1674_v56  ;;  %v1634_v62 = vpop.permute.xlu1 %1633 }
 0x447   : > { %v1347_v63 = vcombine.low %v5584_v23, %v1336_v57  ;;  %v1348_v0 = vcombine.high %v5584_v23, %v1336_v57  ;;  %v1711_v1 = vcombine.low %v1284_v33, %v1634_v62  ;;  %v1712_v2 = vcombine.high %v1284_v33, %v1634_v62 }
 0x448   : > { %v1683_v3 = vrot.slane %v1675_v58, %v5614_v52  ;;  %v1690_v4 = vrot.slane %v1676_v59, %v5614_v52  ;;  %v1699_v5 = vrot.slane %v1691_v60, %v5614_v52  ;;  %v1706_v6 = vrot.slane %v1692_v61, %v5614_v52 }
 0x449   : > { %v1342_v7 = vpop.permute.xlu0 %1341  ;;  %v1355_v21 = vrot.slane %v1347_v63, %v5611_v44  ;;  %v1362_v23 = vrot.slane %v1348_v0, %v5611_v44  ;;  %v1719_v24 = vrot.slane %v1711_v1, %v5611_v44  ;;  %v1726_v26 = vrot.slane %v1712_v2, %v5611_v44 }
 0x44a   : > { %v1779_v8 = vcombine.low %v1683_v3, %v1690_v4  ;;  %v3925_v9 = vcombine.high %v1683_v3, %v1690_v4  ;;  %v1795_v10 = vcombine.low %v1699_v5, %v1706_v6  ;;  %v3926_v11 = vcombine.high %v1699_v5, %v1706_v6  ;;  %v1640_v12 = vpop.permute.xlu1 %1639 }
 0x44b   : > { %v1363_v13 = vcombine.low %v1330_v36, %v1342_v7  ;;  %v1364_v14 = vcombine.high %v1330_v36, %v1342_v7  ;;  %v1727_v19 = vcombine.low %v1628_v51, %v1640_v12  ;;  %v1728_v20 = vcombine.high %v1628_v51, %v1640_v12 }
 0x44c   : > { %v5635_v33 = vrot.slane %v1779_v8, %v5611_v44  ;;  %v5638_v34 = vrot.slane %v3925_v9, %v5611_v44  ;;  %v5641_v35 = vrot.slane %v1795_v10, %v5611_v44  ;;  %v5644_v36 = vrot.slane %v3926_v11, %v5611_v44 }
 0x44d   : > { %v1371_v27 = vrot.slane %v1363_v13, %v5611_v44  ;;  %v1378_v28 = vrot.slane %v1364_v14, %v5611_v44  ;;  %v1735_v30 = vrot.slane %v1727_v19, %v5611_v44  ;;  %v1742_v31 = vrot.slane %v1728_v20, %v5611_v44 }
 0x44e   : > { %v1338_v41 = vpop.permute.xlu1 %1337  ;;  %v1811_v3 = vcombine.low %v5635_v33, %v5638_v34  ;;  %v1827_v4 = vcombine.low %v5641_v35, %v5644_v36 }
 0x44f   : > { %v1379_v37 = vcombine.low %v1355_v21, %v1371_v27  ;;  %v1380_v38 = vcombine.high %v1355_v21, %v1371_v27  ;;  %v1395_v39 = vcombine.low %v1362_v23, %v1378_v28  ;;  %v1396_v40 = vcombine.high %v1362_v23, %v1378_v28 }
 0x450   : > { %v1743_v43 = vcombine.low %v1719_v24, %v1735_v30  ;;  %v1744_v45 = vcombine.high %v1719_v24, %v1735_v30  ;;  %v1759_v46 = vcombine.low %v1726_v26, %v1742_v31  ;;  %v1760_v48 = vcombine.high %v1726_v26, %v1742_v31 }
 0x451   : > { %v1387_v49 = vrot.slane %v1379_v37, %v5614_v52  ;;  %v1394_v50 = vrot.slane %v1380_v38, %v5614_v52  ;;  %v1403_v51 = vrot.slane %v1395_v39, %v5614_v52  ;;  %v1410_v53 = vrot.slane %v1396_v40, %v5614_v52 }
 0x452   : > { %v1751_v54 = vrot.slane %v1743_v43, %v5614_v52  ;;  %v1758_v55 = vrot.slane %v1744_v45, %v5614_v52  ;;  %v1767_v56 = vrot.slane %v1759_v46, %v5614_v52  ;;  %v1774_v57 = vrot.slane %v1760_v48, %v5614_v52  ;;  %v1344_v2 = vpop.permute.xlu1 %1343 }
 0x453   : > { %v1483_v62 = vcombine.low %v1387_v49, %v1394_v50  ;;  %v3921_v63 = vcombine.high %v1387_v49, %v1394_v50  ;;  %v1499_v0 = vcombine.low %v1403_v51, %v1410_v53  ;;  %v3922_v1 = vcombine.high %v1403_v51, %v1410_v53 }
 0x454   : > { %v1847_v58 = vcombine.low %v1751_v54, %v1758_v55  ;;  %v3927_v59 = vcombine.high %v1751_v54, %v1758_v55  ;;  %v1863_v60 = vcombine.low %v1767_v56, %v1774_v57  ;;  %v3928_v61 = vcombine.high %v1767_v56, %v1774_v57 }
 0x455   : > { %v1415_v9 = vcombine.low %v5591_v32, %v1338_v41  ;;  %v1416_v10 = vcombine.high %v5591_v32, %v1338_v41  ;;  %v1431_v11 = vcombine.low %v5608_v42, %v1344_v2  ;;  %v1432_v12 = vcombine.high %v5608_v42, %v1344_v2 }
 0x456   : > { %v5659_v5 = vrot.slane %v1847_v58, %v5611_v44  ;;  %v1862_v6 = vrot.slane %v3927_v59, %v5611_v44  ;;  %v1870_v7 = vrot.slane %v1863_v60, %v5611_v44  ;;  %v1878_v8 = vrot.slane %v3928_v61, %v5611_v44 }
 0x457   : > { %v5669_v13 = vrot.slane %v1483_v62, %v5611_v44  ;;  %v5672_v14 = vrot.slane %v3921_v63, %v5611_v44  ;;  %v5675_v19 = vrot.slane %v1499_v0, %v5611_v44  ;;  %v5678_v20 = vrot.slane %v3922_v1, %v5611_v44 }
 0x458   : > { %v1423_v21 = vrot.slane %v1415_v9, %v5611_v44  ;;  %v1430_v32 = vrot.slane %v1416_v10, %v5611_v44  ;;  %v1439_v23 = vrot.slane %v1431_v11, %v5611_v44  ;;  %v1446_v42 = vrot.slane %v1432_v12, %v5611_v44 }
 0x459   : > { %v1819_v24 = vrot.slane %v1811_v3, %v5614_v52  ;;  %v1835_v26 = vrot.slane %v1827_v4, %v5614_v52  ;;  %v1879_v27 = vcombine.low %v5659_v5, %v1862_v6  ;;  %v1895_v28 = vcombine.low %v1870_v7, %v1878_v8 }
 0x45a   : > { %v1447_v30 = vcombine.low %v1423_v21, %v1439_v23  ;;  %v1448_v31 = vcombine.high %v1423_v21, %v1439_v23  ;;  %v1463_v37 = vcombine.low %v1430_v32, %v1446_v42  ;;  %v1464_v38 = vcombine.high %v1430_v32, %v1446_v42 }
 0x45b   : > { %v1887_v39 = vrot.slane %v1879_v27, %v5614_v52  ;;  %v1903_v40 = vrot.slane %v1895_v28, %v5614_v52  ;;  %v1515_v48 = vcombine.low %v5669_v13, %v5672_v14  ;;  %v1531_v49 = vcombine.low %v5675_v19, %v5678_v20 }
 0x45c   : > { %v1455_v41 = vrot.slane %v1447_v30, %v5614_v52  ;;  %v1462_v43 = vrot.slane %v1448_v31, %v5614_v52  ;;  %v1471_v45 = vrot.slane %v1463_v37, %v5614_v52  ;;  %v1478_v46 = vrot.slane %v1464_v38, %v5614_v52 }
 0x45d   : > { %v1843_v50 = vcombine.low %v1819_v24, %v1835_v26  ;;  %v1911_v51 = vcombine.low %v1887_v39, %v1903_v40  ;;  %v1523_v62 = vrot.slane %v1515_v48, %v5614_v52  ;;  %v1539_v63 = vrot.slane %v1531_v49, %v5614_v52 }
 0x45e   : > { %v1551_v53 = vcombine.low %v1455_v41, %v1462_v43  ;;  %v3923_v54 = vcombine.high %v1455_v41, %v1462_v43  ;;  %v1567_v55 = vcombine.low %v1471_v45, %v1478_v46  ;;  %v3924_v56 = vcombine.high %v1471_v45, %v1478_v46 }
 0x45f   : > { %v1915_v57 = vpack.c.bf16 %v1911_v51, %v1843_v50  ;;  %v1912_v3 = vcombine.high %v1887_v39, %v1903_v40  ;;  %v1880_v4 = vcombine.high %v5659_v5, %v1862_v6  ;;  %v1812_v9 = vcombine.high %v5635_v33, %v5638_v34 }
 0x460   : > { %v1558_v58 = vrot.slane %v1551_v53, %v5611_v44  ;;  %v1566_v59 = vrot.slane %v3923_v54, %v5611_v44  ;;  %v1574_v60 = vrot.slane %v1567_v55, %v5611_v44  ;;  %v1582_v61 = vrot.slane %v3924_v56, %v5611_v44 }
 0x461   : > { %v2220_v0 = vsel %vm2215_vm2, %v1915_v57, 0  ;;  %v1896_v10 = vcombine.high %v1870_v7, %v1878_v8  ;;  %v1844_v21 = vcombine.high %v1819_v24, %v1835_v26  ;;  %v1828_v32 = vcombine.high %v5641_v35, %v5644_v36 }
 0x462   : > { %v1583_v1 = vcombine.low %v1558_v58, %v1566_v59  ;;  %v1599_v2 = vcombine.low %v1574_v60, %v1582_v61  ;;  %4107 = vmatpush3.bf16.xpose.msra.mxu1 %v2220_v0  ;;  %v1547_v23 = vcombine.low %v1523_v62, %v1539_v63  ;;  %v1894_v28 = vrot.slane %v1880_v4, %v5614_v52 }
 0x463   : > { %4112 = vmatprep.subr.bf16.mxu1 %v4897_v25  ;;  %v1916_v27 = vpack.c.bf16 %v1912_v3, %v1844_v21  ;;  %v1910_v5 = vrot.slane %v1896_v10, %v5614_v52  ;;  %v1826_v30 = vrot.slane %v1812_v9, %v5614_v52  ;;  %v1842_v33 = vrot.slane %v1828_v32, %v5614_v52 }
 0x464   : > { %v1591_v11 = vrot.slane %v1583_v1, %v5614_v52  ;;  %v1607_v12 = vrot.slane %v1599_v2, %v5614_v52  ;;  %v1584_v35 = vcombine.high %v1558_v58, %v1566_v59  ;;  %v1600_v36 = vcombine.high %v1574_v60, %v1582_v61 }
 0x465   : > { %v2267_v34 = vsel %vm2215_vm2, %v1916_v27, 0  ;;  %v1913_v7 = vcombine.low %v1894_v28, %v1910_v5  ;;  %v1845_v24 = vcombine.low %v1826_v30, %v1842_v33  ;;  %v1516_v26 = vcombine.high %v5669_v13, %v5672_v14 }
 0x466   : > { %v1615_v42 = vcombine.low %v1591_v11, %v1607_v12  ;;  %v1616_v8 = vcombine.high %v1591_v11, %v1607_v12  ;;  %v1532_v31 = vcombine.high %v5675_v19, %v5678_v20  ;;  %v1548_v37 = vcombine.high %v1523_v62, %v1539_v63 }
 0x467   : > { %v1917_v38 = vpack.c.bf16 %v1913_v7, %v1845_v24  ;;  %v1598_v39 = vrot.slane %v1584_v35, %v5614_v52  ;;  %v1614_v40 = vrot.slane %v1600_v36, %v5614_v52  ;;  %v1530_v43 = vrot.slane %v1516_v26, %v5614_v52 }
 0x468   : > { %v1619_v6 = vpack.c.bf16 %v1615_v42, %v1547_v23  ;;  %v1620_v41 = vpack.c.bf16 %v1616_v8, %v1548_v37  ;;  %v1546_v45 = vrot.slane %v1532_v31, %v5614_v52  ;;  %v1914_v48 = vcombine.high %v1894_v28, %v1910_v5 }
 0x469   : > { %v2314_v46 = vsel %vm2215_vm2, %v1917_v38, 0  ;;  %v1617_v13 = vcombine.low %v1598_v39, %v1614_v40  ;;  %v1846_v14 = vcombine.high %v1826_v30, %v1842_v33  ;;  %v1618_v51 = vcombine.high %v1598_v39, %v1614_v40 }
 0x46a   : > { %4109 = vmatmul.mubr.msk.bf16.vlgmr.msra.gmra.mrb[4].mxu1 %vm2215_vm2, %v1619_v6  ;;  %v1549_v19 = vcombine.low %v1530_v43, %v1546_v45  ;;  %v1550_v53 = vcombine.high %v1530_v43, %v1546_v45  ;;  %v1110_v35 = vsub.s32 2, %v5569_v15 }
 0x46b   : > { %4113 = vmatpush3.bf16.xpose.msra.mxu1 %v2267_v34  ;;  %4114 = vmatprep.mubr.msk.bf16.mxu1 %vm4899_vm1, %v4897_v25  ;;  %v1918_v20 = vpack.c.bf16 %v1914_v48, %v1846_v14 }
 0x46c   : > { %4118 = vmatprep.subr.bf16.mxu1 %v4897_v25  ;;  %v1621_v49 = vpack.c.bf16 %v1617_v13, %v1549_v19  ;;  %v1622_v54 = vpack.c.bf16 %v1618_v51, %v1550_v53  ;;  %v1111_v36 = vrot.slane %v5573_v17, %v1110_v35 }
 0x46d   : > { %v2361_v50 = vsel %vm2215_vm2, %v1918_v20, 0 }
 0x46e   : > { %v5755_v8 = vadd.f32 %v5586_v29, %v1111_v36  ;;  %v5760_v24 = vadd.f32 %v5582_v22, %v1111_v36 }
 0x472   : > { %4115 = vmatmul.mubr.msk.bf16.vlgmr.msra.gmra.mrb[8].mxu1 %vm2215_vm2, %v1620_v41 }
 0x473   : > { %4119 = vmatpush3.bf16.xpose.msra.mxu1 %v2314_v46  ;;  %4120 = vmatprep.mubr.msk.bf16.mxu1 %vm4899_vm1, %v4897_v25 }
 0x474   : > { %4124 = vmatprep.subr.bf16.mxu1 %v4897_v25 }
 0x47a   : > { %4121 = vmatmul.mubr.msk.bf16.vlgmr.msra.gmra.mrb[12].mxu1 %vm2215_vm2, %v1621_v49 }
 0x47b   : > { %4125 = vmatpush3.bf16.xpose.msra.mxu1 %v2361_v50  ;;  %4126 = vmatprep.mubr.msk.bf16.mxu1 %vm4899_vm1, %v4897_v25 }
 0x47c   : > { %4136 = vmatprep.subr.bf16.mxu1 %v4897_v25 }
 0x482   : > { %4127 = vmatmul.mubr.msk.bf16.vlgmr.msra.gmra.mrb[16].mxu1 %vm2215_vm2, %v1622_v54 }
 0x483   : > { %4138 = vmatprep.mubr.msk.bf16.mxu1 %vm4899_vm1, %v4897_v25 }
 0x53d   : > { %v2256_v55 = vpop.f32.mrb[4].mxu1 }
 0x53e   : > { %v2404_v56 = vmul.f32 0.17677669, %v2256_v55  ;;  %v4110_v57 = vpop.f32.mrb[5].mxu1 }
 0x53f   : > { %v2259_v58 = vpop.f32.mrb[6].mxu1 }
 0x540   : > { %v2405_v59 = vmul.f32 0.17677669, %v2259_v58  ;;  %v4111_v60 = vpop.f32.mrb[7].mxu1  ;;  %v2413_v61 = vsel %vm2412_vm3, %v2404_v56, -inf }
 0x541   : > { %2414 = vmax.xlane.f32.xlu0 %v2413_v61 }
 0x542   : > { %v2416_v62 = vsel %vm2412_vm3, %v2405_v59, -inf }
 0x543   : > { %2417 = vmax.xlane.f32.xlu1 %v2416_v62 }
 0x545   : > { %v2303_v63 = vpop.f32.mrb[8].mxu1 }
 0x546   : > { %v2406_v0 = vmul.f32 0.17677669, %v2303_v63  ;;  %v4116_v1 = vpop.f32.mrb[9].mxu1 }
 0x547   : > { %v2306_v2 = vpop.f32.mrb[10].mxu1 }
 0x548   : > { %v2407_v3 = vmul.f32 0.17677669, %v2306_v2  ;;  %v4117_v4 = vpop.f32.mrb[11].mxu1  ;;  %v2419_v9 = vsel %vm2412_vm3, %v2406_v0, -inf }
 0x549   : > { %2420 = vmax.xlane.f32.xlu0 %v2419_v9 }
 0x54a   : > { %v2422_v10 = vsel %vm2412_vm3, %v2407_v3, -inf }
 0x54d   : > { %2423 = vmax.xlane.f32.xlu0 %v2422_v10  ;;  %v2350_v11 = vpop.f32.mrb[12].mxu1 }
 0x54e   : > { %v2408_v12 = vmul.f32 0.17677669, %v2350_v11  ;;  %v4122_v21 = vpop.f32.mrb[13].mxu1 }
 0x54f   : > { %v2353_v32 = vpop.f32.mrb[14].mxu1 }
 0x550   : > { %v5746_v23 = vmul.f32 0.17677669, %v2353_v32  ;;  %v4123_v42 = vpop.f32.mrb[15].mxu1  ;;  %v2425_v27 = vsel %vm2412_vm3, %v2408_v12, -inf }
 0x551   : > { %2426 = vmax.xlane.f32.xlu0 %v2425_v27 }
 0x552   : > { %v2428_v28 = vsel %vm2412_vm3, %v5746_v23, -inf }
 0x553   : > { %2429 = vmax.xlane.f32.xlu1 %v2428_v28 }
 0x555   : > { %v2397_v5 = vpop.f32.mrb[16].mxu1 }
 0x556   : > { %v2410_v6 = vmul.f32 0.17677669, %v2397_v5  ;;  %v4128_v30 = vpop.f32.mrb[17].mxu1 }
 0x557   : > { %v2400_v33 = vpop.f32.mrb[18].mxu1 }
 0x558   : > { %v4129_v34 = vpop.f32.mrb[19].mxu1  ;;  %v2431_v7 = vsel %vm2412_vm3, %v2410_v6, -inf  ;;  %v2411_v26 = vmul.f32 0.17677669, %v2400_v33 }
 0x559   : > { %2432 = vmax.xlane.f32.xlu0 %v2431_v7 }
 0x55a   : > { %v2434_v17 = vsel %vm2412_vm3, %v2411_v26, -inf }
 0x564   : > { %1923 = vrot.lane.b32.xlu1 %v5755_v8, %s4900_s23 }
 0x568   : > { %1927 = vrot.lane.b32.xlu1 %v5760_v24, %s4901_s9 }
 0x56f   : > { %1921 = vrot.lane.b32.xlu0 %v5760_v24, %s4900_s23 }
 0x573   : > { %1933 = vrot.lane.b32.xlu0 %v5760_v24, %s4902_s7 }
 0x58c   : > { %2435 = vmax.xlane.f32.xlu1 %v2434_v17 }
 0x59d   : > { %1929 = vrot.lane.b32.xlu1 %v5755_v8, %s4901_s9 }
 0x5ce   : > { %v2415_v29 = vpop.xlane.xlu0 %2414 }
 0x5cf   : > { %v2437_v31 = vsub.f32 %v2404_v56, %v2415_v29 }
 0x5d0   : > { %v2418_v22 = vpop.xlane.xlu1 %2417 }
 0x5d1   : > { %v2445_v37 = vmul.f32 1.442695, %v2437_v31  ;;  %v2438_v38 = vsub.f32 %v2405_v59, %v2418_v22 }
 0x5d3   : > { %4463 = vpow2.f32 %v2445_v37  ;;  %v2447_v39 = vmul.f32 1.442695, %v2438_v38 }
 0x5d5   : > { %4465 = vpow2.f32 %v2447_v39 }
 0x5d6   : > { %v2421_v40 = vpop.xlane.xlu0 %2420 }
 0x5d7   : > { %v2439_v41 = vsub.f32 %v2406_v0, %v2421_v40 }
 0x5d9   : > { %v2449_v43 = vmul.f32 1.442695, %v2439_v41 }
 0x5da   : > { %v2424_v45 = vpop.xlane.xlu0 %2423 }
 0x5db   : > { %4467 = vpow2.f32 %v2449_v43  ;;  %v2440_v46 = vsub.f32 %v2407_v3, %v2424_v45 }
 0x5dd   : > { %v5771_v48 = vpop.eup %4463  ;;  %v2451_v13 = vmul.f32 1.442695, %v2440_v46 }
 0x5de   : > { %v2427_v14 = vpop.xlane.xlu0 %2426  ;;  %v2461_v19 = vsel %vm2412_vm3, %v5771_v48, 0.0 }
 0x5df   : > { %v5775_v20 = vpop.eup %4465  ;;  %4469 = vpow2.f32 %v2451_v13  ;;  %v2441_v49 = vsub.f32 %v2408_v12, %v2427_v14  ;;  %2462 = vadd.xlane.f32.xlu0 %v2461_v19 }
 0x5e0   : > { %v2464_v50 = vsel %vm2412_vm3, %v5775_v20, 0.0  ;;  %v2430_v0 = vpop.xlane.xlu1 %2429 }
 0x5e1   : > { %v2453_v51 = vmul.f32 1.442695, %v2441_v49  ;;  %2465 = vadd.xlane.f32.xlu1 %v2464_v50  ;;  %v2442_v1 = vsub.f32 %v5746_v23, %v2430_v0 }
 0x5e3   : > { %4471 = vpow2.f32 %v2453_v51  ;;  %v2455_v2 = vmul.f32 1.442695, %v2442_v1 }
 0x5e4   : > { %v1924_v3 = vpop.permute.xlu1 %1923 }
 0x5e5   : > { %v5779_v53 = vpop.eup %4467 }
 0x5e6   : > { %v2433_v54 = vpop.xlane.xlu0 %2432  ;;  %v2467_v55 = vsel %vm2412_vm3, %v5779_v53, 0.0 }
 0x5e7   : > { %v2443_v56 = vsub.f32 %v2410_v6, %v2433_v54  ;;  %2468 = vadd.xlane.f32.xlu0 %v2467_v55 }
 0x5e8   : > { %v1928_v4 = vpop.permute.xlu1 %1927 }
 0x5e9   : > { %v5783_v57 = vpop.eup %4469  ;;  %v2457_v58 = vmul.f32 1.442695, %v2443_v56  ;;  %v1939_v5 = vcombine.low %v5760_v24, %v1928_v4  ;;  %v1940_v30 = vcombine.high %v5760_v24, %v1928_v4 }
 0x5ea   : > { %v2470_v59 = vsel %vm2412_vm3, %v5783_v57, 0.0  ;;  %v1922_v23 = vpop.permute.xlu0 %1921 }
 0x5eb   : > { %4473 = vpow2.f32 %v2457_v58  ;;  %2471 = vadd.xlane.f32.xlu1 %v2470_v59  ;;  %v1947_v34 = vrot.slane %v1939_v5, %v5611_v44  ;;  %v1954_v36 = vrot.slane %v1940_v30, %v5611_v44 }
 0x5ec   : > { %4475 = vpow2.f32 %v2455_v2 }
 0x5ed   : > { %v5787_v60 = vpop.eup %4471 }
 0x5ee   : > { %v2473_v61 = vsel %vm2412_vm3, %v5787_v60, 0.0  ;;  %v1934_v27 = vpop.permute.xlu0 %1933 }
 0x5ef   : > { %2474 = vadd.xlane.f32.xlu0 %v2473_v61  ;;  %v1955_v28 = vcombine.low %v1922_v23, %v1934_v27  ;;  %v1956_v6 = vcombine.high %v1922_v23, %v1934_v27 }
 0x5f1   : > { %v1963_v33 = vrot.slane %v1955_v28, %v5611_v44  ;;  %v1970_v7 = vrot.slane %v1956_v6, %v5611_v44 }
 0x5f3   : > { %v1972_v17 = vcombine.high %v1947_v34, %v1963_v33  ;;  %v1987_v29 = vcombine.low %v1954_v36, %v1970_v7  ;;  %v1988_v31 = vcombine.high %v1954_v36, %v1970_v7 }
 0x5f5   : > { %v5791_v62 = vpop.eup %4473  ;;  %v1986_v38 = vrot.slane %v1972_v17, %v5614_v52  ;;  %v1995_v24 = vrot.slane %v1987_v29, %v5614_v52  ;;  %v2002_v39 = vrot.slane %v1988_v31, %v5614_v52 }
 0x5f6   : > { %v2479_v63 = vsel %vm2412_vm3, %v5791_v62, 0.0  ;;  %v5798_v11 = vpop.eup %4475 }
 0x5f7   : > { %2480 = vadd.xlane.f32.xlu0 %v2479_v63  ;;  %v2476_v21 = vsel %vm2412_vm3, %v5798_v11, 0.0  ;;  %v2091_v14 = vcombine.low %v1995_v24, %v2002_v39  ;;  %v3930_v19 = vcombine.high %v1995_v24, %v2002_v39 }
 0x5f9   : > { %v2098_v63 = vrot.slane %v2091_v14, %v5611_v44  ;;  %v2106_v0 = vrot.slane %v3930_v19, %v5611_v44 }
 0x5fb   : > { %v2123_v23 = vcombine.low %v2098_v63, %v2106_v0  ;;  %v2124_v29 = vcombine.high %v2098_v63, %v2106_v0 }
 0x5fc   : > { %1935 = vrot.lane.b32.xlu1 %v5755_v8, %s4902_s7 }
 0x5fd   : > { %v2138_v14 = vrot.slane %v2124_v29, %v5614_v52 }
 0x619   : > { %v2436_v9 = vpop.xlane.xlu1 %2435 }
 0x61a   : > { %v2444_v10 = vsub.f32 %v2411_v26, %v2436_v9  ;;  %v1971_v26 = vcombine.low %v1947_v34, %v1963_v33 }
 0x61c   : > { %v2459_v12 = vmul.f32 1.442695, %v2444_v10  ;;  %v1979_v37 = vrot.slane %v1971_v26, %v5614_v52  ;;  %v2131_v26 = vrot.slane %v2123_v23, %v5614_v52 }
 0x61d   : > { %v1930_v35 = vpop.permute.xlu1 %1929 }
 0x61e   : > { %4477 = vpow2.f32 %v2459_v12  ;;  %v2075_v41 = vcombine.low %v1979_v37, %v1986_v38  ;;  %v2007_v43 = vcombine.low %v5755_v8, %v1930_v35  ;;  %v2008_v45 = vcombine.high %v5755_v8, %v1930_v35 }
 0x61f   : > { %v3929_v13 = vcombine.high %v1979_v37, %v1986_v38 }
 0x620   : > { %2477 = vadd.xlane.f32.xlu1 %v2476_v21  ;;  %v2082_v54 = vrot.slane %v2075_v41, %v5611_v44  ;;  %v2015_v55 = vrot.slane %v2007_v43, %v5611_v44  ;;  %v2022_v56 = vrot.slane %v2008_v45, %v5611_v44 }
 0x621   : > { %v2090_v61 = vrot.slane %v3929_v13, %v5611_v44 }
 0x623   : > { %v2108_v17 = vcombine.high %v2082_v54, %v2090_v61 }
 0x625   : > { %v2122_v13 = vrot.slane %v2108_v17, %v5614_v52 }
 0x627   : > { %v2141_v0 = vcombine.low %v2122_v13, %v2138_v14 }
 0x628   : > { %v5802_v32 = vpop.eup %4477 }
 0x629   : > { %v2482_v42 = vsel %vm2412_vm3, %v5802_v32, 0.0 }
 0x62a   : > { %2483 = vadd.xlane.f32.xlu0 %v2482_v42  ;;  %v2107_v42 = vcombine.low %v2082_v54, %v2090_v61 }
 0x62c   : > { %v2115_v36 = vrot.slane %v2107_v42, %v5614_v52 }
 0x62e   : > { %v2139_v19 = vcombine.low %v2115_v36, %v2131_v26 }
 0x66c   : > { %v2463_v46 = vpop.xlane.xlu0 %2462 }
 0x66d   : > { %4479 = vrcp.f32 %v2463_v46 }
 0x66e   : > { %v2466_v22 = vpop.xlane.xlu1 %2465 }
 0x66f   : > { %4481 = vrcp.f32 %v2466_v22 }
 0x674   : > { %v2469_v58 = vpop.xlane.xlu0 %2468 }
 0x677   : > { %v4480_v35 = vpop.eup %4479 }
 0x678   : > { %v2472_v40 = vpop.xlane.xlu1 %2471  ;;  %v2493_v61 = vmul.f32 %v4480_v35, %v5771_v48 }
 0x679   : > { %4483 = vrcp.f32 %v2472_v40  ;;  %v4482_v31 = vpop.eup %4481 }
 0x67a   : > { %4485 = vrcp.f32 %v2469_v58  ;;  %v2494_v54 = vmul.f32 %v4482_v31, %v5775_v20 }
 0x67c   : > { %v1936_v49 = vpop.permute.xlu1 %1935  ;;  %v2475_v48 = vpop.xlane.xlu0 %2474 }
 0x67d   : > { %v2023_v50 = vcombine.low %v1924_v3, %v1936_v49  ;;  %v2024_v51 = vcombine.high %v1924_v3, %v1936_v49  ;;  %4487 = vrcp.f32 %v2475_v48 }
 0x67f   : > { %v2031_v59 = vrot.slane %v2023_v50, %v5611_v44  ;;  %v2038_v8 = vrot.slane %v2024_v51, %v5611_v44  ;;  %v2140_v50 = vcombine.high %v2115_v36, %v2131_v26 }
 0x681   : > { %v2039_v1 = vcombine.low %v2015_v55, %v2031_v59  ;;  %v2040_v2 = vcombine.high %v2015_v55, %v2031_v59  ;;  %v2055_v3 = vcombine.low %v2022_v56, %v2038_v8  ;;  %v2056_v4 = vcombine.high %v2022_v56, %v2038_v8 }
 0x683   : > { %v2047_v9 = vrot.slane %v2039_v1, %v5614_v52  ;;  %v2054_v10 = vrot.slane %v2040_v2, %v5614_v52  ;;  %v2063_v12 = vrot.slane %v2055_v3, %v5614_v52  ;;  %v2070_v21 = vrot.slane %v2056_v4, %v5614_v52  ;;  %v4484_v39 = vpop.eup %4483 }
 0x684   : > { %v4486_v46 = vpop.eup %4485  ;;  %v2496_v55 = vmul.f32 %v4484_v39, %v5783_v57  ;;  %v2142_v1 = vcombine.high %v2122_v13, %v2138_v14  ;;  %v2501_v2 = vpack.c.bf16 %v2494_v54, %v2493_v61  ;;  %v2481_v4 = vpop.xlane.xlu0 %2480 }
 0x685   : > { %v2143_v27 = vcombine.low %v2047_v9, %v2054_v10  ;;  %v3931_v28 = vcombine.high %v2047_v9, %v2054_v10  ;;  %v2159_v5 = vcombine.low %v2063_v12, %v2070_v21  ;;  %v3932_v6 = vcombine.high %v2063_v12, %v2070_v21 }
 0x686   : > { %v2495_v63 = vmul.f32 %v4486_v46, %v5779_v53 }
 0x687   : > { %v2150_v30 = vrot.slane %v2143_v27, %v5611_v44  ;;  %v2158_v33 = vrot.slane %v3931_v28, %v5611_v44  ;;  %v2166_v34 = vrot.slane %v2159_v5, %v5611_v44  ;;  %v2174_v7 = vrot.slane %v3932_v6, %v5611_v44  ;;  %v4488_v9 = vpop.eup %4487 }
 0x688   : > { %v2502_v3 = vpack.c.bf16 %v2496_v55, %v2495_v63  ;;  %v2497_v21 = vmul.f32 %v4488_v9, %v5787_v60  ;;  %v4411_v60 = vld [vmem:[%s5496_s17] sm:$0xff]  }
 0x689   : > { %v2175_v22 = vcombine.low %v2150_v30, %v2158_v33  ;;  %v2191_v37 = vcombine.low %v2166_v34, %v2174_v7  ;;  %v2176_v38 = vcombine.high %v2150_v30, %v2158_v33  ;;  %v2192_v24 = vcombine.high %v2166_v34, %v2174_v7  ;;  %v4413_v33 = vld [vmem:[%s5496_s17 + $0x10] sm:$0xff]   ;;  %v4416_v34 = vld [vmem:[%s5496_s17 + $0x28] sm:$0xff]  }
 0x68b   : > { %v2183_v40 = vrot.slane %v2175_v22, %v5614_v52  ;;  %v2199_v41 = vrot.slane %v2191_v37, %v5614_v52  ;;  %v2190_v43 = vrot.slane %v2176_v38, %v5614_v52  ;;  %v2206_v45 = vrot.slane %v2192_v24, %v5614_v52 }
 0x68d   : > { %v2207_v49 = vcombine.low %v2183_v40, %v2199_v41  ;;  %v2208_v51 = vcombine.high %v2183_v40, %v2199_v41  ;;  %v2209_v59 = vcombine.low %v2190_v43, %v2206_v45  ;;  %v2210_v8 = vcombine.high %v2190_v43, %v2206_v45 }
 0x68f   : > { %v2211_v56 = vpack.c.bf16 %v2207_v49, %v2139_v19  ;;  %v2212_v58 = vpack.c.bf16 %v2208_v51, %v2140_v50  ;;  %v2213_v20 = vpack.c.bf16 %v2209_v59, %v2141_v0  ;;  %v2214_v57 = vpack.c.bf16 %v2210_v8, %v2142_v1 }
 0x691   : > { %4131 = vmatpush3.bf16.msra.mxu0 %v2211_v56  ;;  %4137 = vmatpush3.bf16.msra.mxu1 %v2212_v58 }
 0x692   : > { %4142 = vmatprep.subr.bf16.mxu0 %v4897_v25  ;;  %4148 = vmatprep.subr.bf16.mxu1 %v4897_v25 }
 0x694   : > { %4133 = vmatmul.mubr.msk.bf16.vlgmr.msra.gmra.mrb[4].mxu0 %vm2412_vm3, %v2501_v2  ;;  %4139 = vmatmul.mubr.msk.bf16.vlgmr.msra.gmra.mrb[20].mxu1 %vm2412_vm3, %v2502_v3 }
 0x695   : > { %4143 = vmatpush3.bf16.msra.mxu0 %v2213_v20  ;;  %4149 = vmatpush3.bf16.msra.mxu1 %v2214_v57 }
 0x696   : > { %4144 = vmatprep.mubr.msk.bf16.mxu0 %vm4899_vm1, %v4897_v25  ;;  %4150 = vmatprep.mubr.msk.bf16.mxu1 %vm4899_vm1, %v4897_v25 }
 0x697   : > { %4154 = vmatprep.subr.bf16.mxu0 %v4897_v25 }
 0x6ad   : > { %v2478_v53 = vpop.xlane.xlu1 %2477 }
 0x6ae   : > { %4489 = vrcp.f32 %v2478_v53 }
 0x6af   : > { %4491 = vrcp.f32 %v2481_v4 }
 0x6b7   : > { %v2484_v10 = vpop.xlane.xlu0 %2483 }
 0x6b8   : > { %v4490_v12 = vpop.eup %4489  ;;  %4493 = vrcp.f32 %v2484_v10 }
 0x6b9   : > { %v2498_v42 = vmul.f32 %v4490_v12, %v5798_v11  ;;  %v4492_v27 = vpop.eup %4491  ;;  %v4412_v11 = vld [vmem:[%s5496_s17 + $0x8] sm:$0xff]  }
 0x6ba   : > { %v2499_v5 = vmul.f32 %v4492_v27, %v5791_v62  ;;  %v4414_v62 = vld [vmem:[%s5496_s17 + $0x18] sm:$0xff]  }
 0x6bb   : > { %v2503_v23 = vpack.c.bf16 %v2498_v42, %v2497_v21 }
 0x6bd   : > { %4145 = vmatmul.mubr.msk.bf16.vlgmr.msra.gmra.mrb[8].mxu0 %vm2412_vm3, %v2503_v23 }
 0x6be   : > { %4170 = vmatprep.mubr.msk.bf16.mxu0 %vm4899_vm1, %v4897_v25  ;;  %4155 = vmatpush3.bf16.msra.mxu0 %v4411_v60 }
 0x6bf   : > { %4156 = vmatprep.subr.bf16.mxu0 %v4897_v25 }
 0x6c2   : > { %v4494_v28 = vpop.eup %4493  ;;  %4157 = vmatpush3.bf16.msra.mxu0 %v4412_v11 }
 0x6c3   : > { %v2500_v6 = vmul.f32 %v4494_v28, %v5802_v32  ;;  %4158 = vmatprep.subr.bf16.mxu0 %v4897_v25  ;;  %v4415_v32 = vld [vmem:[%s5496_s17 + $0x20] sm:$0xff]  }
 0x6c5   : > { %v2504_v30 = vpack.c.bf16 %v2500_v6, %v2499_v5 }
 0x6c6   : > { %4159 = vmatpush3.bf16.msra.mxu0 %v4413_v33 }
 0x6c7   : > { %4151 = vmatmul.mubr.msk.bf16.vlgmr.msra.gmra.mrb[24].mxu1 %vm2412_vm3, %v2504_v30  ;;  %4160 = vmatprep.subr.bf16.mxu0 %v4897_v25 }
 0x6c8   : > { %3285 = vmatprep.mubr.bf16.mxu1 %v4898_v47 }
 0x6ca   : > { %4161 = vmatpush3.bf16.msra.mxu0 %v4414_v62 }
 0x6cb   : > { %4162 = vmatprep.subr.bf16.mxu0 %v4897_v25 }
 0x6ce   : > { %4163 = vmatpush3.bf16.msra.mxu0 %v4415_v32 }
 0x6cf   : > { %4164 = vmatprep.subr.bf16.mxu0 %v4897_v25 }
 0x6d2   : > { %4165 = vmatpush3.bf16.msra.mxu0 %v4416_v34 }
 0x6d3   : > { %4166 = vmatprep.subr.bf16.mxu0 %v4897_v25 }
 0x767   : > { %v2542_v47 = vpop.f32.mrb[4].mxu0  ;;  %v2586_v7 = vpop.f32.mrb[20].mxu1 }
 0x768   : > { %v4134_v35 = vpop.f32.mrb[5].mxu0  ;;  %v4140_v36 = vpop.f32.mrb[21].mxu1 }
 0x769   : > { %v2545_v26 = vpop.f32.mrb[6].mxu0  ;;  %v2589_v17 = vpop.f32.mrb[22].mxu1 }
 0x76a   : > { %v4135_v29 = vpop.f32.mrb[7].mxu0  ;;  %v4141_v31 = vpop.f32.mrb[23].mxu1 }
 0x76b   : > { %v4417_v29 = vld [vmem:[%s5496_s17 + $0x30] sm:$0xff]  }
 0x76c   : > { %4167 = vmatpush3.bf16.msra.mxu0 %v4417_v29  ;;  %v4424_v29 = vld [vmem:[%s5498_s5 + $0x14] ss:$8 sps:$4 sm:$0xff]  }
 0x76d   : > { %4168 = vmatprep.subr.bf16.mxu0 %v4897_v25 }
 0x790   : > { %v2630_v22 = vpop.f32.mrb[8].mxu0 }
 0x791   : > { %v2681_v37 = vcombine.low %v2542_v47, %v2630_v22  ;;  %v2682_v38 = vcombine.high %v2542_v47, %v2630_v22  ;;  %v4146_v24 = vpop.f32.mrb[9].mxu0 }
 0x792   : > { %v2633_v39 = vpop.f32.mrb[10].mxu0 }
 0x793   : > { %v2749_v40 = vcombine.low %v2545_v26, %v2633_v39  ;;  %v2750_v41 = vcombine.high %v2545_v26, %v2633_v39  ;;  %v4147_v43 = vpop.f32.mrb[11].mxu0  ;;  %v2689_v19 = vrot.slane %v2681_v37, %v5611_v44  ;;  %v2696_v49 = vrot.slane %v2682_v38, %v5611_v44 }
 0x795   : > { %v2757_v0 = vrot.slane %v2749_v40, %v5611_v44  ;;  %v2764_v1 = vrot.slane %v2750_v41, %v5611_v44 }
 0x79a   : > { %v2674_v45 = vpop.f32.mrb[24].mxu1 }
 0x79b   : > { %v2697_v46 = vcombine.low %v2586_v7, %v2674_v45  ;;  %v2698_v13 = vcombine.high %v2586_v7, %v2674_v45  ;;  %v4152_v14 = vpop.f32.mrb[25].mxu1 }
 0x79c   : > { %v2677_v50 = vpop.f32.mrb[26].mxu1 }
 0x79d   : > { %v2705_v51 = vrot.slane %v2697_v46, %v5611_v44  ;;  %v2712_v54 = vrot.slane %v2698_v13, %v5611_v44  ;;  %v2765_v55 = vcombine.low %v2589_v17, %v2677_v50  ;;  %v2766_v56 = vcombine.high %v2589_v17, %v2677_v50  ;;  %v4153_v58 = vpop.f32.mrb[27].mxu1 }
 0x79f   : > { %v2713_v59 = vcombine.low %v2689_v19, %v2705_v51  ;;  %v2714_v8 = vcombine.high %v2689_v19, %v2705_v51  ;;  %v2729_v61 = vcombine.low %v2696_v49, %v2712_v54  ;;  %v2730_v63 = vcombine.high %v2696_v49, %v2712_v54 }
 0x7a0   : > { %v2773_v2 = vrot.slane %v2765_v55, %v5611_v44  ;;  %v2780_v3 = vrot.slane %v2766_v56, %v5611_v44  ;;  %v4418_v56 = vld [vmem:[%s5496_s17 + $0x38] sm:$0xff]   ;;  %s6208_s17 = sld [smem:[#allocation25_spill]] }
 0x7a1   : > { %v2721_v20 = vrot.slane %v2713_v59, %v5614_v52  ;;  %v2728_v57 = vrot.slane %v2714_v8, %v5614_v52  ;;  %v2737_v48 = vrot.slane %v2729_v61, %v5614_v52  ;;  %v2744_v53 = vrot.slane %v2730_v63, %v5614_v52  ;;  %4169 = vmatpush3.bf16.msra.mxu0 %v4418_v56 }
 0x7a2   : > { %v2781_v4 = vcombine.low %v2757_v0, %v2773_v2  ;;  %v2782_v9 = vcombine.high %v2757_v0, %v2773_v2  ;;  %v2797_v10 = vcombine.low %v2764_v1, %v2780_v3  ;;  %v2798_v12 = vcombine.high %v2764_v1, %v2780_v3 }
 0x7a3   : > { %v2817_v21 = vcombine.low %v2721_v20, %v2728_v57  ;;  %v3941_v42 = vcombine.high %v2721_v20, %v2728_v57  ;;  %v2833_v23 = vcombine.low %v2737_v48, %v2744_v53  ;;  %v3942_v27 = vcombine.high %v2737_v48, %v2744_v53 }
 0x7a4   : > { %v2789_v28 = vrot.slane %v2781_v4, %v5614_v52  ;;  %v2796_v5 = vrot.slane %v2782_v9, %v5614_v52  ;;  %v2805_v6 = vrot.slane %v2797_v10, %v5614_v52  ;;  %v2812_v30 = vrot.slane %v2798_v12, %v5614_v52 }
 0x7a5   : > { %v2824_v60 = vrot.slane %v2817_v21, %v5611_v44  ;;  %v2832_v11 = vrot.slane %v3941_v42, %v5611_v44  ;;  %v2840_v33 = vrot.slane %v2833_v23, %v5611_v44  ;;  %v2848_v62 = vrot.slane %v3942_v27, %v5611_v44 }
 0x7a6   : > { %v2885_v32 = vcombine.low %v2789_v28, %v2796_v5  ;;  %v3943_v34 = vcombine.high %v2789_v28, %v2796_v5  ;;  %v2901_v47 = vcombine.low %v2805_v6, %v2812_v30  ;;  %v3944_v7 = vcombine.high %v2805_v6, %v2812_v30  ;;  %v3945_v28 = vld [vmem:[%s873_s13] ss:$0 sm:$0xff]  ;;  %p3989_p0 = scmp.ne.s32.totalorder %s6208_s17, 1 }
 0x7a7   : > { %v2850_v35 = vcombine.high %v2824_v60, %v2832_v11  ;;  %v2866_v36 = vcombine.high %v2840_v33, %v2848_v62  ;;  %v2849_v26 = vcombine.low %v2824_v60, %v2832_v11  ;;  %v2865_v17 = vcombine.low %v2840_v33, %v2848_v62  ;;  %v4507_v11 = vld [vmem:[#allocation2] sm:$0xff] }
 0x7a8   : > { %v2892_v31 = vrot.slane %v2885_v32, %v5611_v44  ;;  %v2900_v22 = vrot.slane %v3943_v34, %v5611_v44  ;;  %v2908_v37 = vrot.slane %v2901_v47, %v5611_v44  ;;  %v2916_v38 = vrot.slane %v3944_v7, %v5611_v44  ;;  %v4508_v34 = vld [vmem:[#allocation2 + $0x8] sm:$0xff] }
 0x7a9   : > { %v2864_v24 = vrot.slane %v2850_v35, %v5614_v52  ;;  %v2880_v39 = vrot.slane %v2866_v36, %v5614_v52  ;;  %v2857_v40 = vrot.slane %v2849_v26, %v5614_v52  ;;  %v2873_v41 = vrot.slane %v2865_v17, %v5614_v52  ;;  %v4419_v36 = vld [vmem:[%s5498_s5] ss:$8 sps:$4 sm:$0xff]   ;;  %v4421_v26 = vld [vmem:[%s5498_s5 + $0x4] ss:$8 sps:$4 sm:$0xff]   ;;  %v4422_v17 = vld [vmem:[%s5498_s5 + $0x10] ss:$8 sps:$4 sm:$0xff]  }
 0x7aa   : > { %v2918_v43 = vcombine.high %v2892_v31, %v2900_v22  ;;  %v2934_v45 = vcombine.high %v2908_v37, %v2916_v38  ;;  %v2917_v46 = vcombine.low %v2892_v31, %v2900_v22  ;;  %v2933_v13 = vcombine.low %v2908_v37, %v2916_v38  ;;  %3253 = vmatprep.subr.bf16.mxu1 %v4421_v26  ;;  %v4425_v31 = vld [vmem:[%s5498_s5 + $0x20] ss:$8 sps:$4 sm:$0xff]   ;;  %v4427_v22 = vld [vmem:[%s5498_s5 + $0x24] ss:$8 sps:$4 sm:$0xff]   ;;  %v4430_v37 = vld [vmem:[%s5498_s5 + $0x34] ss:$8 sps:$4 sm:$0xff]  }
 0x7ab   : > { %v2883_v14 = vcombine.low %v2864_v24, %v2880_v39  ;;  %v2881_v19 = vcombine.low %v2857_v40, %v2873_v41  ;;  %v2882_v49 = vcombine.high %v2857_v40, %v2873_v41  ;;  %v2884_v44 = vcombine.high %v2864_v24, %v2880_v39  ;;  %3254 = vmatpush1.bf16.msra.mxu1 %v4419_v36  ;;  %v4428_v38 = vld [vmem:[%s5498_s5 + $0x30] ss:$8 sps:$4 sm:$0xff]   ;;  %v4433_v24 = vld [vmem:[%s5498_s5 + $0x44] ss:$8 sps:$4 sm:$0xff]   ;;  %v4431_v39 = vld [vmem:[%s5498_s5 + $0x40] ss:$8 sps:$4 sm:$0xff]  }
 0x7ac   : > { %v2932_v50 = vrot.slane %v2918_v43, %v5614_v52  ;;  %v2948_v51 = vrot.slane %v2934_v45, %v5614_v52  ;;  %v2925_v54 = vrot.slane %v2917_v46, %v5614_v52  ;;  %v2941_v55 = vrot.slane %v2933_v13, %v5614_v52  ;;  %3255 = vmatprep.subr.bf16.mxu1 %v4424_v29  ;;  %v4436_v40 = vld [vmem:[%s5498_s5 + $0x54] ss:$8 sps:$4 sm:$0xff]   ;;  %v4434_v41 = vld [vmem:[%s5498_s5 + $0x50] ss:$8 sps:$4 sm:$0xff]   ;;  %v4439_v43 = vld [vmem:[%s5498_s5 + $0x64] ss:$8 sps:$4 sm:$0xff]  }
 0x7ad   : > { %v4437_v45 = vld [vmem:[%s5498_s5 + $0x60] ss:$8 sps:$4 sm:$0xff]   ;;  %v4442_v46 = vld [vmem:[%s5498_s5 + $0x74] ss:$8 sps:$4 sm:$0xff]   ;;  %v4440_v13 = vld [vmem:[%s5498_s5 + $0x70] ss:$8 sps:$4 sm:$0xff]  }
 0x7ae   : > { %v2951_v58 = vcombine.low %v2932_v50, %v2948_v51  ;;  %v2950_v59 = vcombine.high %v2925_v54, %v2941_v55  ;;  %v2949_v8 = vcombine.low %v2925_v54, %v2941_v55  ;;  %v2952_v61 = vcombine.high %v2932_v50, %v2948_v51  ;;  %v3161_v36 = vld [vmem:[%s5490_s18] sm:$0x3]  ;;  %s6209_s5 = sld [smem:[#allocation54_spill]] (!%p3989_p0) }
 0x7af   : > { %3256 = vmatpush1.bf16.msra.mxu1 %v4422_v17  ;;  %v3166_v26 = vrot.slane %v3161_v36, %v1102_v16  ;;  %v3170_v17 = vrot.slane %v3161_v36, %v1106_v18  ;;  %vm4906_vm6 = vmmov (!%p3989_p0), 0   ;;  %vm3564_vm7 = vcmask (!%p3989_p0), 1043456  }
 0x7b0   : > { %v4369_v63 = vpack.i.bf16 %v2951_v58, %v2883_v14  ;;  %v4364_v25 = vpack.i.bf16 %v2950_v59, %v2882_v49  ;;  %v4374_v0 = vpack.i.bf16 %v2952_v61, %v2884_v44  ;;  %3257 = vmatprep.subr.bf16.mxu1 %v4427_v22 }
 0x7b2   : > { %4370 = vrot.lane.b32.xlu1 %v4369_v63, %s4901_s9  ;;  %4365 = vrot.lane.b32.xlu0 %v4364_v25, %s4902_s7  ;;  %v3954_v25 = vld [vmem:[%s876_s19] ss:$0 sm:$0xff] }
 0x7b3   : > { %3258 = vmatpush1.bf16.msra.mxu1 %v4425_v31 }
 0x7b4   : > { %3259 = vmatprep.subr.bf16.mxu1 %v4430_v37  ;;  %v3519_v36 = vld [vmem:[%s6209_s5] sm:$0x3] (!%p3989_p0) }
 0x7b6   : > { %4375 = vrot.lane.b32.xlu1 %v4374_v0, %s4900_s23 }
 0x7b7   : > { %3260 = vmatpush1.bf16.msra.mxu1 %v4428_v38 }
 0x7b8   : > { %3261 = vmatprep.subr.bf16.mxu1 %v4433_v24 }
 0x7bb   : > { %3262 = vmatpush1.bf16.msra.mxu1 %v4431_v39 }
 0x7bc   : > { %3263 = vmatprep.subr.bf16.mxu1 %v4436_v40 }
 0x7bf   : > { %3264 = vmatpush1.bf16.msra.mxu1 %v4434_v41 }
 0x7c0   : > { %3265 = vmatprep.subr.bf16.mxu1 %v4439_v43 }
 0x7c3   : > { %3266 = vmatpush1.bf16.msra.mxu1 %v4437_v45 }
 0x7c4   : > { %3267 = vmatprep.subr.bf16.mxu1 %v4442_v46 }
 0x7c7   : > { %3268 = vmatpush1.bf16.msra.mxu1 %v4440_v13 }
 0x824   : > { %v4371_v1 = vpop.permute.xlu1 %4370  ;;  %v4366_v2 = vpop.permute.xlu0 %4365 }
 0x825   : > { %v4368_v3 = vunpack.i.h.bf16 %v4366_v2  ;;  %v4367_v20 = vunpack.i.l.bf16 %v4366_v2  ;;  %v4373_v52 = vunpack.i.h.bf16 %v4371_v1  ;;  %v4372_v57 = vunpack.i.l.bf16 %v4371_v1 }
 0x827   : > { %v2977_v48 = vsel %vm2215_vm2, %v2881_v19, %v4367_v20  ;;  %v2978_v53 = vsel %vm2215_vm2, %v2949_v8, %v4368_v3 }
 0x828   : > { %v4376_v4 = vpop.permute.xlu1 %4375  ;;  %v2980_v12 = vsel %vm2979_vm4, %v2977_v48, %v4372_v57  ;;  %v2981_v21 = vsel %vm2979_vm4, %v2978_v53, %v4373_v52  ;;  %v3955_v48 = vld [vmem:[%s879_s12] ss:$0 sm:$0xff] }
 0x829   : > { %v4378_v9 = vunpack.i.h.bf16 %v4376_v4  ;;  %v4377_v10 = vunpack.i.l.bf16 %v4376_v4 }
 0x82b   : > { %v2983_v42 = vsel %vm2982_vm5, %v2980_v12, %v4377_v10  ;;  %v2984_v23 = vsel %vm2982_vm5, %v2981_v21, %v4378_v9  ;;  %v4443_v12 = vld [vmem:[%s5500_s2 + $0x40] sm:$0xff]  }
 0x82c   : > { %v2985_v27 = vpack.c.bf16 %v2984_v23, %v2983_v42  ;;  %v4444_v21 = vld [vmem:[%s5500_s2] sm:$0xff]   ;;  %4042 = vmatprep.subr.bf16.mxu0 %v4443_v12  ;;  %v4445_v42 = vld [vmem:[%s5500_s2 + $0x48] sm:$0xff]  }
 0x82d   : > { %v4446_v23 = vld [vmem:[%s5500_s2 + $0x8] sm:$0xff]  }
 0x82e   : > { %4171 = vmatmul.mubr.bf16.vlgmr.msra.gmra.mrb[12].mxu0 %v2985_v27  ;;  %v4447_v27 = vld [vmem:[%s5500_s2 + $0x50] sm:$0xff]  }
 0x82f   : > { %4043 = vmatpush3.bf16.msra.mxu0 %v4444_v21 }
 0x830   : > { %4044 = vmatprep.subr.bf16.mxu0 %v4445_v42 }
 0x833   : > { %4045 = vmatpush3.bf16.msra.mxu0 %v4446_v23 }
 0x834   : > { %4046 = vmatprep.subr.bf16.mxu0 %v4447_v27  ;;  %v3972_v27 = vld [vmem:[%s886_s11] ss:$0 sm:$0xff] }
 0x901   : > { %v3091_v5 = vpop.f32.mrb[12].mxu0 }
 0x902   : > { %v3092_v6 = vadd.f32 %v3945_v28, %v3091_v5  ;;  %v4172_v30 = vpop.f32.mrb[13].mxu0  ;;  %v4449_v5 = vld [vmem:[%s5500_s2 + $0x58] sm:$0xff]  }
 0x903   : > { %v3094_v60 = vpop.f32.mrb[14].mxu0  ;;  %v4451_v30 = vld [vmem:[%s5500_s2 + $0x60] sm:$0xff]  }
 0x904   : > { %v5921_v33 = vadd.f32 %v4507_v11, %v3092_v6  ;;  %v3095_v62 = vadd.f32 %v3945_v28, %v3094_v60  ;;  %v4173_v32 = vpop.f32.mrb[15].mxu0  ;;  %v4448_v28 = vld [vmem:[%s5500_s2 + $0x10] sm:$0xff]   ;;  %v4450_v6 = vld [vmem:[%s5500_s2 + $0x18] sm:$0xff]   ;;  %v4452_v60 = vld [vmem:[%s5500_s2 + $0x20] sm:$0xff]  }
 0x905   : > { %4047 = vmatpush3.bf16.msra.mxu0 %v4448_v28  ;;  %v4453_v11 = vld [vmem:[%s5500_s2 + $0x68] sm:$0xff]   ;;  %v4455_v32 = vld [vmem:[%s5500_s2 + $0x70] sm:$0xff]  }
 0x906   : > { %v5923_v47 = vadd.f32 %v4508_v34, %v3095_v62  ;;  %3100 = vadd.xlane.f32.xlu1 %v5921_v33  ;;  %v3106_v7 = vmul.f32 %v5921_v33, %v5921_v33  ;;  %4048 = vmatprep.subr.bf16.mxu0 %v4449_v5  ;;  %v4454_v62 = vld [vmem:[%s5500_s2 + $0x28] sm:$0xff]   ;;  %v4456_v34 = vld [vmem:[%s5500_s2 + $0x30] sm:$0xff]  }
 0x908   : > { %3102 = vadd.xlane.f32.xlu0 %v5923_v47  ;;  %v3107_v35 = vmul.f32 %v5923_v47, %v5923_v47 }
 0x909   : > { %4049 = vmatpush3.bf16.msra.mxu0 %v4450_v6 }
 0x90a   : > { %4050 = vmatprep.subr.bf16.mxu0 %v4451_v30 }
 0x90c   : > { %3108 = vadd.xlane.f32.xlu0 %v3106_v7  ;;  %v4457_v7 = vld [vmem:[%s5500_s2 + $0x78] sm:$0xff]  }
 0x90d   : > { %4051 = vmatpush3.bf16.msra.mxu0 %v4452_v60 }
 0x90e   : > { %4052 = vmatprep.subr.bf16.mxu0 %v4453_v11 }
 0x910   : > { %3110 = vadd.xlane.f32.xlu0 %v3107_v35  ;;  %v4458_v35 = vld [vmem:[%s5500_s2 + $0x38] sm:$0xff]  }
 0x911   : > { %4053 = vmatpush3.bf16.msra.mxu0 %v4454_v62 }
 0x912   : > { %4054 = vmatprep.subr.bf16.mxu0 %v4455_v32 }
 0x915   : > { %4055 = vmatpush3.bf16.msra.mxu0 %v4456_v34 }
 0x916   : > { %4056 = vmatprep.subr.bf16.mxu0 %v4457_v7 }
 0x919   : > { %4057 = vmatpush3.bf16.msra.mxu0 %v4458_v35  ;;  %v4905_v35 = vmov (!%p3989_p0), 0.0  }
 0x91a   : > { %4174 = vmatprep.subr.bf16.mxu0 (!%p3989_p0), %v4905_v35 }
 0x993   : > { %v3101_v14 = vpop.xlane.xlu1 %3100 }
 0x994   : > { %v3104_v49 = vmul.f32 0.0078125, %v3101_v14 }
 0x995   : > { %v3103_v19 = vpop.xlane.xlu0 %3102 }
 0x996   : > { %v3114_v50 = vmul.f32 %v3104_v49, %v3104_v49  ;;  %v3105_v51 = vmul.f32 0.0078125, %v3103_v19  ;;  %v3118_v2 = vsub.f32 %v5921_v33, %v3104_v49 }
 0x998   : > { %v3115_v58 = vmul.f32 %v3105_v51, %v3105_v51  ;;  %v3119_v20 = vsub.f32 %v5923_v47, %v3105_v51 }
 0x999   : > { %v3109_v44 = vpop.xlane.xlu0 %3108 }
 0x99a   : > { %v3112_v54 = vmul.f32 0.0078125, %v3109_v44 }
 0x99c   : > { %v3116_v55 = vsub.f32 %v3112_v54, %v3114_v50 }
 0x99d   : > { %v3111_v56 = vpop.xlane.xlu0 %3110 }
 0x99e   : > { %v3120_v59 = vadd.f32 1e-06, %v3116_v55  ;;  %v3113_v8 = vmul.f32 0.0078125, %v3111_v56 }
 0x9a0   : > { %4495 = vrsqrt.f32 %v3120_v59  ;;  %v3117_v61 = vsub.f32 %v3113_v8, %v3115_v58 }
 0x9a2   : > { %v3121_v63 = vadd.f32 1e-06, %v3117_v61 }
 0x9a4   : > { %4497 = vrsqrt.f32 %v3121_v63 }
 0x9aa   : > { %v4496_v0 = vpop.eup %4495 }
 0x9ab   : > { %v3131_v1 = vmul.f32 %v4496_v0, %v3954_v25 }
 0x9ad   : > { %v3133_v57 = vmul.f32 %v3131_v1, %v3118_v2 }
 0x9ae   : > { %v4498_v3 = vpop.eup %4497 }
 0x9af   : > { %v3132_v52 = vmul.f32 %v4498_v3, %v3954_v25  ;;  %v3142_v4 = vadd.f32 %v3955_v48, %v3133_v57 }
 0x9b1   : > { %v3134_v53 = vmul.f32 %v3132_v52, %v3119_v20 }
 0x9b3   : > { %v3143_v9 = vadd.f32 %v3955_v48, %v3134_v53 }
 0x9b5   : > { %v3144_v10 = vpack.c.bf16 %v3143_v9, %v3142_v4 }
 0x9b7   : > { %3286 = vmatmul.mubr.bf16.vlgmr.msra.gmra.mrb[28].mxu1 %v3144_v10 }
 0xa8a   : > { %v3287_v29 = vpop.f32.mrb[28].mxu1 }
 0xa8b   : > { %v3288_v31 = vadd.f32 %v3287_v29, %v3166_v26  ;;  %v3289_v22 = vpop.f32.mrb[29].mxu1 }
 0xa8c   : > { %v3290_v37 = vadd.f32 %v3289_v22, %v3170_v17  ;;  %v3291_v38 = vpop.f32.mrb[30].mxu1 }
 0xa8d   : > { %v3300_v24 = vmul.f32 0.044715, %v3288_v31  ;;  %v3292_v39 = vadd.f32 %v3291_v38, %v3166_v26  ;;  %v3293_v40 = vpop.f32.mrb[31].mxu1  ;;  %v3296_v3 = vmul.f32 0.5, %v3288_v31 }
 0xa8e   : > { %v3301_v41 = vmul.f32 0.044715, %v3290_v37  ;;  %v3294_v43 = vadd.f32 %v3293_v40, %v3170_v17  ;;  %v3297_v57 = vmul.f32 0.5, %v3290_v37 }
 0xa8f   : > { %v3304_v45 = vmul.f32 %v3300_v24, %v3288_v31  ;;  %v3302_v46 = vmul.f32 0.044715, %v3292_v39  ;;  %v3298_v20 = vmul.f32 0.5, %v3292_v39 }
 0xa90   : > { %v3305_v13 = vmul.f32 %v3301_v41, %v3290_v37  ;;  %v3303_v14 = vmul.f32 0.044715, %v3294_v43  ;;  %v3299_v48 = vmul.f32 0.5, %v3294_v43 }
 0xa91   : > { %v3308_v19 = vmul.f32 %v3304_v45, %v3288_v31  ;;  %v3306_v49 = vmul.f32 %v3302_v46, %v3292_v39 }
 0xa92   : > { %v3309_v16 = vmul.f32 %v3305_v13, %v3290_v37  ;;  %v3307_v44 = vmul.f32 %v3303_v14, %v3294_v43 }
 0xa93   : > { %v3312_v15 = vadd.f32 %v3308_v19, %v3288_v31  ;;  %v3310_v18 = vmul.f32 %v3306_v49, %v3292_v39 }
 0xa94   : > { %v3311_v50 = vmul.f32 %v3307_v44, %v3294_v43  ;;  %v3313_v51 = vadd.f32 %v3309_v16, %v3290_v37 }
 0xa95   : > { %v3316_v54 = vmul.f32 0.7978846, %v3312_v15  ;;  %v3314_v55 = vadd.f32 %v3310_v18, %v3292_v39 }
 0xa96   : > { %v3315_v56 = vadd.f32 %v3311_v50, %v3294_v43  ;;  %v3317_v58 = vmul.f32 0.7978846, %v3313_v51 }
 0xa97   : > { %4499 = vtanh.f32 %v3316_v54  ;;  %v3318_v59 = vmul.f32 0.7978846, %v3314_v55 }
 0xa98   : > { %v3319_v8 = vmul.f32 0.7978846, %v3315_v56  ;;  %4501 = vtanh.f32 %v3317_v58 }
 0xa99   : > { %4503 = vtanh.f32 %v3318_v59 }
 0xa9a   : > { %4505 = vtanh.f32 %v3319_v8 }
 0xaa1   : > { %v4500_v61 = vpop.eup %4499 }
 0xaa2   : > { %v4502_v63 = vpop.eup %4501  ;;  %v3324_v25 = vadd.f32 1.0, %v4500_v61 }
 0xaa3   : > { %v4504_v0 = vpop.eup %4503  ;;  %v3325_v1 = vadd.f32 1.0, %v4502_v63 }
 0xaa4   : > { %v4506_v2 = vpop.eup %4505  ;;  %v3326_v52 = vadd.f32 1.0, %v4504_v0  ;;  %v3328_v4 = vmul.f32 %v3324_v25, %v3296_v3 }
 0xaa5   : > { %v3327_v53 = vadd.f32 1.0, %v4506_v2  ;;  %v3329_v10 = vmul.f32 %v3325_v1, %v3297_v57 }
 0xaa6   : > { %v3330_v9 = vmul.f32 %v3326_v52, %v3298_v20 }
 0xaa7   : > { %v3331_v12 = vmul.f32 %v3327_v53, %v3299_v48 }
 0xaa8   : > { %v3332_v21 = vpack.c.bf16 %v3330_v9, %v3328_v4 }
 0xaa9   : > { %v3333_v42 = vpack.c.bf16 %v3331_v12, %v3329_v10 }
 0xaab   : > { %3501 = vmatprep.mubr.bf16.mxu0 %v3333_v42 }
 0xaac   : > { %3502 = vmatmul.mubr.bf16.vlgmr.msra.gmra.mrb[16].mxu0 %v3332_v21 }
 0xaad   : > { %4176 = vmatprep.mubr.msk.bf16.mxu0 (!%p3989_p0), %vm4906_vm6, %v4905_v35 }
 0xb7f   : > { %v4058_v23 = vpop.f32.mrb[16].mxu0 }
 0xb80   : > { %v4059_v28 = vpop.f32.mrb[17].mxu0 }
 0xb81   : > { %v4060_v5 = vadd.f32 %v4059_v28, %v4058_v23  ;;  %v4061_v6 = vpop.f32.mrb[18].mxu0 }
 0xb82   : > { %v4062_v30 = vpop.f32.mrb[19].mxu0 }
 0xb83   : > { %v3504_v60 = vadd.f32 %v4060_v5, %v3972_v27  ;;  %v4063_v11 = vadd.f32 %v4062_v30, %v4061_v6  ;;  %3517 = sbr.rel (%p3989_p0) target bundleno = 3331 (0xd03), region = 128 }
 0xb85   : > { %v3510_v62 = vadd.f32 %v3504_v60, %v5921_v33  ;;  %v3507_v32 = vadd.f32 %v4063_v11, %v3972_v27 }
 0xb87   : > { %3512 = vst [vmem:[#allocation2] sm:$0xff] %v3510_v62  ;;  %v3511_v34 = vadd.f32 %v3507_v32, %v5923_v47 }
 0xb89   : > { %3513 = vst [vmem:[#allocation2 + $0x8] sm:$0xff] %v3511_v34  ;;  %v3518_v7 = vpack.c.bf16 (!%p3989_p0), %v3511_v34, %v3510_v62 }
 0xb8b   : > { %4175 = vmatpush3.bf16.msra.mxu0 %v3518_v7 }
 0xb8e   : > { %4177 = vmatmul.mubr.msk.bf16.vlgmr.msra.gmra.mrb[0].mxu0 %vm2412_vm3, %v3519_v36 }
 0xc61   : > { %v3557_v33 = vpop.f32.mrb[0].mxu0 }
 0xc62   : > { %v4178_v47 = vpop.f32.mrb[1].mxu0  ;;  %v3563_v26 = vmul.f32 %v3557_v33, %v3557_v33 }
 0xc63   : > { %v3560_v17 = vpop.f32.mrb[2].mxu0 }
 0xc64   : > { %v4179_v29 = vpop.f32.mrb[3].mxu0  ;;  %v3565_v31 = vsel %vm3564_vm7, %v3563_v26, 0.0 }
 0xc65   : > { %3566 = vadd.xlane.f32.xlu0 %v3565_v31 }
 0xcf2   : > { %v3567_v22 = vpop.xlane.xlu0 %3566 }
 0xcf3   : > { %v3568_v37 = vmax.f32 %v3567_v22, 1e-24 }
 0xcf5   : > { %4509 = vrsqrt.f32 %v3568_v37 }
 0xcff   : > { %v4510_v38 = vpop.eup %4509 }
 0xd00   : > { %v3570_v24 = vmul.f32 %v4510_v38, %v3557_v33 }
 0xd02   : > { %3571 = vst [vmem:[%s5502_s3] sm:$0xf] %v3570_v24 }
 0xd03 PF: > { %s6210_s2 = sld [smem:[#allocation26_spill]]  ;;  %s6211_s14 = sld [smem:[#allocation36_spill]] }
 0xd04   : > { %s6212_s6 = sld [smem:[#allocation55_spill]]  ;;  %s3586_s0 = sshll.u32 %s5502_s3, 4  ;;  %s3587_s0 = int_to_ptr.vmem [resolvable:$true] %s3586_s0 }
 0xd05   : > { %s3573_s1 = scalar_lea.sflag [#allocation5], %s5431_s8  ;;  %s4745_s23 = scalar_lea.vmem %s3587_s0, 64 }
 0xd06   : > { %p4746_p5 = scmp.ne.s32.totalorder %s3587_s0, %s4745_s23  ;;  %s4907_s9 = smov [#allocation15]  }
 0xd07   : > { %s4749_s7 = sshll.u32 %s4907_s9, 4  ;;  %s4750_s7 = int_to_ptr.vmem [resolvable:$false] %s4749_s7 }
 0xd08   : > { %s4751_s29 = scalar_lea.vmem %s4750_s7, 128  ;;  %p4752_p12 = scmp.lt.s32.totalorder %s3587_s0, %s4750_s7 }
 0xd09   : > { %s3992_s21 = sshll.u32 %s6210_s2, 6  ;;  %p6213_p3 = scmp.ne.s32.totalorder %s6211_s14, 0 }
 0xd0a   : > { %s5997_s27 = scalar_lea.hbm %s6212_s6, %s3992_s21  ;;  %p4753_p9 = scmp.lt.s32.totalorder %s4751_s29, %s4745_s23 }
 0xd0b   : > { %p4747_p1 = pnand %p4746_p5, %p6213_p3 }
 0xd0c   : > { %p4754_p6 = por %p4753_p9, %p4752_p12 }
 0xd0d   : > { %p4748_p8 = pneg %p4747_p1 }
 0xd0f   : > { %p4755_p10 = pnand %p4754_p6, %p4748_p8 }
 0xd11   : > { %4758 = shalt.err (!%p4755_p10)
}
 0xd12   : > { %s4759_s8 = scalar_lea.hbm %s5997_s27, 64  ;;  %s4763_s10 = scalar_lea.hbm %s6212_s6, 128 }
 0xd13   : > { %p4760_p11 = scmp.ne.s32.totalorder %s5997_s27, %s4759_s8  ;;  %p4764_p7 = scmp.lt.u32.totalorder %s5997_s27, %s6212_s6 }
 0xd14   : > { %p4765_p13 = scmp.lt.u32.totalorder %s4763_s10, %s4759_s8  ;;  %p4767_p5 = scmp.lt.u32.totalorder %s4759_s8, %s5997_s27 }
 0xd15   : > { %p4761_p2 = pnand %p4760_p11, %p6213_p3 }
 0xd16   : > { %p4766_p0 = por %p4765_p13, %p4764_p7 }
 0xd17   : > { %p4762_p4 = pneg %p4761_p2 }
 0xd18   : > { %p4768_p1 = por %p4767_p5, %p4766_p0 }
 0xd1a   : > { %p4769_p8 = pnand %p4768_p1, %p4762_p4 }
 0xd1c   : > { %4772 = shalt.err (!%p4769_p8)
}
 0xd1d   : > { %4206 = dma.vmem_to_hbm [thread:$0]  (%p6213_p3), %s3587_s0, 64, %s5997_s27, %s3573_s1  }
 0xd1e PF: > { %s6214_s24 = sld [smem:[#allocation29_spill]]  ;;  %s6215_s20 = sld [smem:[#allocation23_spill]] }
 0xd1f   : > { %s6216_s15 = sld [smem:[#allocation37_spill]] }
 0xd24   : > { %p4245_p12 = scmp.ge.s32.totalorder %s6214_s24, 2  ;;  %s3598_s25 = sand.u32 1, %s6215_s20  }
 0xd25   : > { %p6217_p9 = scmp.ne.s32.totalorder %s6216_s15, 0  ;;  %s3599_s12 = scalar_lea.sflag [#allocation5], %s3598_s25 }
 0xd27   : > { %p4235_p6 = pnand %p4245_p12, %p6217_p9 }
 0xd29   : > { %4834 = dma.done.wait (!%p4235_p6), %s3599_s12, 64  }
 0xd2a   : > { %4836 = vsyncadd (!%p4235_p6), %s3599_s12, 4294967232  ;;  %s35_s1 = sadd.s32 1, %s6214_s24   ;;  %s6218_s24 = sld [smem:[#allocation21_spill]] }
 0xd2b   : > { %p32_p10 = scmp.ge.s32.totalorder %s35_s1, 6   ;;  %s6219_s25 = sld [smem:[#allocation22_spill]] }
 0xd2c   : > { %s6220_s26 = sld [smem:[#allocation33_spill]]  ;;  %s6221_s18 = sld [smem:[#allocation24_spill]] }
 0xd2d   : > { %s6222_s29 = sld [smem:[#allocation32_spill]]  ;;  %s6223_s0 = sld [smem:[#allocation27_spill]] }
 0xd2e   : > { %s6224_s30 = sld [smem:[#allocation28_spill]]  ;;  %s6225_s19 = sld [smem:[#allocation30_spill]] }
 0xd2f   : > { %s6226_s17 = sld [smem:[#allocation31_spill]]  ;;  %s6227_s27 = smov %s4855_s28 }
 0xd30   :  { %34 = sbr.rel (!%p32_p10) target bundleno = 30 (0x1e), region = 221 }
 0xd32   : > { %s6228_s28 = smov %s6221_s18 }
 0xd34   : > { %s6229_s18 = smov %s6225_s19 }
 0xd35   : > { %s6230_s19 = smov %s6226_s17 }
 0xd37   :  { %3604 = vsyncpa [#allocation4], 1 }
 0xd38   :  { %3606 = vsyncpa [#allocation4 + $0x1], 1 }
 0xd39   :  { %3607 = vsyncpa [#allocation7], 1 }
 0xd3a   :  { %3608 = vsyncpa [#allocation10], 1 }
 0xd3b   :  { %3609 = vsyncpa [#allocation5], 1 }
 0xd3c   :  { %3611 = vsyncpa [#allocation5 + $0x1], 1 }

</bundles_post_ra>
